<compile_context>
chip_gen: v7x
topology: tpu7x:2x2x1
jax: 0.10.0
libtpu: 0.0.40
codegen_flags: <defaults>
</compile_context>

<pallas_src>
import functools

import jax
import jax.numpy as jnp
from jax.experimental import pallas as pl
from jax.experimental.pallas import tpu as pltpu

NUM_LAYERS = 3     # number of "worker layers" in the pipeline
HIDDEN = 128       # hidden size of each stage
BATCH = 128        # total batch (dim 0 of xs)


def _pipeline_kernel(x_ref, w_ref, b_ref, o_ref):
    """One grid step == one M-tile of the batch pushed through all layers."""
    num_layers = w_ref.shape[0]
    m = x_ref.shape[0]

    # Two independent row streams per M-tile: with both streams in the same
    # trace, the LLO scheduler can overlap stream B's matmul (MXU) with stream
    # A's gelu / bf16 cast (VPU + EUP) in the same bundles.
    n_sub = 2 if (m % 16 == 0 and m >= 16) else 1
    sub = m // n_sub

    hs = []
    for s in range(n_sub):
        h = x_ref[pl.ds(s * sub, sub), :]
        if h.dtype != jnp.float32:          # avoid a no-op cast when already f32
            h = h.astype(jnp.float32)
        hs.append(h)
    hs = tuple(hs)

    def apply_layer(streams, w, b, activate):
        outs = []
        for h in streams:
            z = jnp.dot(h.astype(jnp.bfloat16), w,
                        preferred_element_type=jnp.float32) + b
            if activate:
                z = jax.nn.gelu(z, approximate=True)
            outs.append(z)
        return tuple(outs)

    if num_layers <= 6:
        # Shallow stacks: full static unroll.
        for layer in range(num_layers):
            hs = apply_layer(hs, w_ref[layer],
                             b_ref[layer].astype(jnp.float32),
                             layer < num_layers - 1)
    else:
        # Deep stacks: fori_loop with dynamic layer indexing bounds vreg live
        # ranges / instruction count instead of a 12+-layer static unroll.
        def body(layer, carry):
            return apply_layer(carry, w_ref[layer],
                               b_ref[layer].astype(jnp.float32), True)
        hs = jax.lax.fori_loop(0, num_layers - 1, body, hs)
        hs = apply_layer(hs, w_ref[num_layers - 1],
                         b_ref[num_layers - 1].astype(jnp.float32), False)

    for s in range(n_sub):
        o_ref[pl.ds(s * sub, sub), :] = hs[s].astype(o_ref.dtype)


def _tensorcores_per_chip():
    """Best-effort TC count per chip (2 on v7x, 1 on v5e/v6e)."""
    try:
        kind = jax.local_devices()[0].device_kind.lower()
    except Exception:
        return 1
    return 2 if "v7" in kind else 1


def _pick_m_tile(batch, cores_per_chip=1):
    """Largest 8-aligned divisor of batch under the per-chip cap."""
    cap = min(batch, 512)                    # 512-row tiles ~85% of HBM roofline
    if cores_per_chip >= 2:
        # Ensure >=2 grid steps on megacore chips so the "parallel" axis
        # actually shards across both TensorCores.
        half = (batch // 2) // 8 * 8
        if half >= 8:
            cap = min(cap, half)
    if batch <= 8 or batch % 8 != 0:
        return batch                         # full-extent block always legal
    for cand in range(cap - cap % 8, 7, -8):
        if batch % cand == 0:
            return cand
    return batch


@functools.lru_cache(maxsize=None)
def _build_pipeline_call(batch, hidden, num_layers, m_tile,
                         x_dtype, w_dtype, b_dtype, single_buffer_weights):
    num_tiles = batch // m_tile
    isz = lambda dt: jnp.dtype(dt).itemsize

    # Explicit VMEM budget: resident weights (+biases), double-buffered
    # activation in/out tiles, f32 temporaries headroom. Capped at 64 MiB
    # (v7x physical per-TC VMEM).
    weight_bytes = num_layers * hidden * hidden * isz(w_dtype)
    bias_bytes = num_layers * hidden * isz(b_dtype)
    act_bytes = m_tile * hidden * isz(x_dtype)
    w_bufs = 1 if single_buffer_weights else 2
    vmem_limit = (w_bufs * (weight_bytes + bias_bytes)
                  + 2 * act_bytes                    # input, double-buffered
                  + 2 * act_bytes                    # output, double-buffered
                  + 8 * m_tile * hidden * 4          # in-kernel f32 temporaries
                  + (8 << 20))                       # headroom
    vmem_limit = int(min(max(vmem_limit, 16 << 20), 64 << 20))

    # Advisory cost estimate so XLA can schedule/overlap around this call.
    # (Weights counted once; undercounts per-TC re-DMA on a sharded v7x grid.)
    cost = pl.CostEstimate(
        flops=2 * batch * hidden * hidden * num_layers,
        transcendentals=batch * hidden * max(num_layers - 1, 0),
        bytes_accessed=(2 * batch * hidden * isz(x_dtype)
                        + weight_bytes + bias_bytes),
    )

    # Constant index_map => weights/biases DMA'd once and resident across grid
    # steps; single-buffered since they are never re-fetched.
    wkw = dict(pipeline_mode=pl.Buffered(1)) if single_buffer_weights else {}

    grid_spec = pltpu.PrefetchScalarGridSpec(
        num_scalar_prefetch=0,
        grid=(num_tiles,),
        in_specs=[
            pl.BlockSpec((m_tile, hidden), lambda i: (i, 0)),
            pl.BlockSpec((num_layers, hidden, hidden), lambda i: (0, 0, 0), **wkw),
            pl.BlockSpec((num_layers, 1, hidden), lambda i: (0, 0, 0), **wkw),
        ],
        out_specs=pl.BlockSpec((m_tile, hidden), lambda i: (i, 0)),
    )

    call = pl.pallas_call(
        _pipeline_kernel,
        out_shape=jax.ShapeDtypeStruct((batch, hidden), x_dtype),
        grid_spec=grid_spec,
        compiler_params=pltpu.CompilerParams(
            dimension_semantics=("parallel",),
            vmem_limit_bytes=vmem_limit,
        ),
        cost_estimate=cost,
    )
    return jax.jit(call)


def distributed_sequential_forward(xs, weights, biases, *, m_tile=None):
    """Equivalent of DistributedCUDARPCSequential.forward(xs)."""
    batch, hidden = xs.shape
    num_layers = weights.shape[0]
    assert weights.shape == (num_layers, hidden, hidden)
    assert biases.shape == (num_layers, 1, hidden)

    if m_tile is None:
        m_tile = _pick_m_tile(batch, _tensorcores_per_chip())
    assert batch % m_tile == 0, (batch, m_tile)

    key = (batch, hidden, num_layers, m_tile,
           jnp.dtype(xs.dtype), jnp.dtype(weights.dtype), jnp.dtype(biases.dtype))
    try:
        fn = _build_pipeline_call(*key, True)
        return fn(xs, weights, biases)
    except Exception:
        # This JAX build rejected single-buffered weight specs; fall back to
        # default double-buffering (correctness identical, 2x weight VMEM).
        fn = _build_pipeline_call(*key, False)
        return fn(xs, weights, biases)


def _reference_forward(xs, weights, biases):
    """Plain-JAX reference of the same sequential pipeline (sanity check)."""
    h = xs.astype(jnp.float32)
    num_layers = weights.shape[0]
    for layer in range(num_layers):
        h = jnp.dot(h.astype(jnp.bfloat16), weights[layer],
                    preferred_element_type=jnp.float32)
        h = h + biases[layer, 0].astype(jnp.float32)
        if layer < num_layers - 1:
            h = jax.nn.gelu(h, approximate=True)
    return h.astype(xs.dtype)


if __name__ == "__main__":
    key = jax.random.PRNGKey(0)
    k_x, k_w, k_b = jax.random.split(key, 3)

    xs = jax.random.normal(k_x, (BATCH, HIDDEN), dtype=jnp.float32)
    # Deterministic synthetic "materialized" worker-layer parameters.
    # Weights stored in bf16 (native MXU input dtype, half the HBM bytes).
    weights = (
        jax.random.normal(k_w, (NUM_LAYERS, HIDDEN, HIDDEN), dtype=jnp.float32)
        * (1.0 / jnp.sqrt(HIDDEN))
    ).astype(jnp.bfloat16)
    biases = jax.random.normal(k_b, (NUM_LAYERS, 1, HIDDEN), dtype=jnp.float32) * 0.01

    out = distributed_sequential_forward(xs, weights, biases)
    out = jax.block_until_ready(out)

    ref = _reference_forward(xs, weights, biases)
    assert out.shape == (BATCH, HIDDEN)
    assert jnp.allclose(out, ref, atol=2e-2, rtol=2e-2), (
        float(jnp.max(jnp.abs(out - ref)))
    )

    print("KERNEL_OK")
</pallas_src>

<mosaic_0001>
module attributes {stable_mosaic.version = 11 : i64} {
  func.func @_pipeline_kernel(%arg0: i32, %arg1: memref<128x128xf32, #tpu.memory_space<vmem>>, %arg2: memref<3x128x128xbf16, #tpu.memory_space<vmem>>, %arg3: memref<3x1x128xf32, #tpu.memory_space<vmem>>, %arg4: memref<128x128xf32, #tpu.memory_space<vmem>>) attributes {dimension_semantics = [#tpu.dimension_semantics<parallel>], iteration_bounds = array<i64: 1>, scalar_prefetch = 0 : i64, scratch_operands = 0 : i64, tpu.core_type = #tpu.core_type<tc>, window_params = [{transform_indices = @transform_0, window_bounds = array<i64: 128, 128>}, {pipeline_mode = #tpu.pipeline_mode<synchronous>, transform_indices = @transform_1, window_bounds = array<i64: 3, 128, 128>}, {pipeline_mode = #tpu.pipeline_mode<synchronous>, transform_indices = @transform_2, window_bounds = array<i64: 3, 1, 128>}, {transform_indices = @transform_3, window_bounds = array<i64: 128, 128>}]} {
    %c0 = arith.constant 0 : index
    %c0_0 = arith.constant 0 : index
    %0 = vector.load %arg1[%c0, %c0_0] : memref<128x128xf32, #tpu.memory_space<vmem>>, vector<64x128xf32>
    %c64 = arith.constant 64 : index
    %c0_1 = arith.constant 0 : index
    %1 = vector.load %arg1[%c64, %c0_1] : memref<128x128xf32, #tpu.memory_space<vmem>>, vector<64x128xf32>
    %c0_2 = arith.constant 0 : index
    %c0_3 = arith.constant 0 : index
    %c0_4 = arith.constant 0 : index
    %2 = vector.load %arg2[%c0_2, %c0_3, %c0_4] : memref<3x128x128xbf16, #tpu.memory_space<vmem>>, vector<1x128x128xbf16>
    %3 = vector.shape_cast %2 : vector<1x128x128xbf16> to vector<128x128xbf16>
    %c0_5 = arith.constant 0 : index
    %c0_6 = arith.constant 0 : index
    %c0_7 = arith.constant 0 : index
    %4 = vector.load %arg3[%c0_5, %c0_6, %c0_7] : memref<3x1x128xf32, #tpu.memory_space<vmem>>, vector<1x1x128xf32>
    %5 = vector.shape_cast %4 : vector<1x1x128xf32> to vector<1x128xf32>
    %6 = arith.truncf %0 : vector<64x128xf32> to vector<64x128xbf16>
    %cst = arith.constant dense<0.000000e+00> : vector<64x128xf32>
    %7 = tpu.matmul %6, %3, %cst {dimension_numbers = #tpu.dot_dimension_numbers<[1], [0], [0], [1], [0, 0, 1, 1], [], []>} : vector<64x128xbf16>, vector<128x128xbf16>, vector<64x128xf32> -> vector<64x128xf32>
    %8 = vector.broadcast %5 : vector<1x128xf32> to vector<64x128xf32>
    %9 = arith.addf %7, %8 : vector<64x128xf32>
    %10 = arith.mulf %9, %9 : vector<64x128xf32>
    %11 = arith.mulf %9, %10 : vector<64x128xf32>
    %cst_8 = arith.constant 4.471500e-02 : f32
    %12 = vector.broadcast %cst_8 : f32 to vector<64x128xf32>
    %13 = arith.mulf %12, %11 : vector<64x128xf32>
    %14 = arith.addf %9, %13 : vector<64x128xf32>
    %cst_9 = arith.constant 0.797884583 : f32
    %15 = vector.broadcast %cst_9 : f32 to vector<64x128xf32>
    %16 = arith.mulf %15, %14 : vector<64x128xf32>
    %17 = math.tanh %16 : vector<64x128xf32>
    %cst_10 = arith.constant 1.000000e+00 : f32
    %18 = vector.broadcast %cst_10 : f32 to vector<64x128xf32>
    %19 = arith.addf %18, %17 : vector<64x128xf32>
    %cst_11 = arith.constant 5.000000e-01 : f32
    %20 = vector.broadcast %cst_11 : f32 to vector<64x128xf32>
    %21 = arith.mulf %20, %19 : vector<64x128xf32>
    %22 = arith.mulf %9, %21 : vector<64x128xf32>
    %23 = arith.truncf %1 : vector<64x128xf32> to vector<64x128xbf16>
    %cst_12 = arith.constant dense<0.000000e+00> : vector<64x128xf32>
    %24 = tpu.matmul %23, %3, %cst_12 {dimension_numbers = #tpu.dot_dimension_numbers<[1], [0], [0], [1], [0, 0, 1, 1], [], []>} : vector<64x128xbf16>, vector<128x128xbf16>, vector<64x128xf32> -> vector<64x128xf32>
    %25 = vector.broadcast %5 : vector<1x128xf32> to vector<64x128xf32>
    %26 = arith.addf %24, %25 : vector<64x128xf32>
    %27 = arith.mulf %26, %26 : vector<64x128xf32>
    %28 = arith.mulf %26, %27 : vector<64x128xf32>
    %cst_13 = arith.constant 4.471500e-02 : f32
    %29 = vector.broadcast %cst_13 : f32 to vector<64x128xf32>
    %30 = arith.mulf %29, %28 : vector<64x128xf32>
    %31 = arith.addf %26, %30 : vector<64x128xf32>
    %cst_14 = arith.constant 0.797884583 : f32
    %32 = vector.broadcast %cst_14 : f32 to vector<64x128xf32>
    %33 = arith.mulf %32, %31 : vector<64x128xf32>
    %34 = math.tanh %33 : vector<64x128xf32>
    %cst_15 = arith.constant 1.000000e+00 : f32
    %35 = vector.broadcast %cst_15 : f32 to vector<64x128xf32>
    %36 = arith.addf %35, %34 : vector<64x128xf32>
    %cst_16 = arith.constant 5.000000e-01 : f32
    %37 = vector.broadcast %cst_16 : f32 to vector<64x128xf32>
    %38 = arith.mulf %37, %36 : vector<64x128xf32>
    %39 = arith.mulf %26, %38 : vector<64x128xf32>
    %c1 = arith.constant 1 : index
    %c0_17 = arith.constant 0 : index
    %c0_18 = arith.constant 0 : index
    %40 = vector.load %arg2[%c1, %c0_17, %c0_18] : memref<3x128x128xbf16, #tpu.memory_space<vmem>>, vector<1x128x128xbf16>
    %41 = vector.shape_cast %40 : vector<1x128x128xbf16> to vector<128x128xbf16>
    %c1_19 = arith.constant 1 : index
    %c0_20 = arith.constant 0 : index
    %c0_21 = arith.constant 0 : index
    %42 = vector.load %arg3[%c1_19, %c0_20, %c0_21] : memref<3x1x128xf32, #tpu.memory_space<vmem>>, vector<1x1x128xf32>
    %43 = vector.shape_cast %42 : vector<1x1x128xf32> to vector<1x128xf32>
    %44 = arith.truncf %22 : vector<64x128xf32> to vector<64x128xbf16>
    %cst_22 = arith.constant dense<0.000000e+00> : vector<64x128xf32>
    %45 = tpu.matmul %44, %41, %cst_22 {dimension_numbers = #tpu.dot_dimension_numbers<[1], [0], [0], [1], [0, 0, 1, 1], [], []>} : vector<64x128xbf16>, vector<128x128xbf16>, vector<64x128xf32> -> vector<64x128xf32>
    %46 = vector.broadcast %43 : vector<1x128xf32> to vector<64x128xf32>
    %47 = arith.addf %45, %46 : vector<64x128xf32>
    %48 = arith.mulf %47, %47 : vector<64x128xf32>
    %49 = arith.mulf %47, %48 : vector<64x128xf32>
    %cst_23 = arith.constant 4.471500e-02 : f32
    %50 = vector.broadcast %cst_23 : f32 to vector<64x128xf32>
    %51 = arith.mulf %50, %49 : vector<64x128xf32>
    %52 = arith.addf %47, %51 : vector<64x128xf32>
    %cst_24 = arith.constant 0.797884583 : f32
    %53 = vector.broadcast %cst_24 : f32 to vector<64x128xf32>
    %54 = arith.mulf %53, %52 : vector<64x128xf32>
    %55 = math.tanh %54 : vector<64x128xf32>
    %cst_25 = arith.constant 1.000000e+00 : f32
    %56 = vector.broadcast %cst_25 : f32 to vector<64x128xf32>
    %57 = arith.addf %56, %55 : vector<64x128xf32>
    %cst_26 = arith.constant 5.000000e-01 : f32
    %58 = vector.broadcast %cst_26 : f32 to vector<64x128xf32>
    %59 = arith.mulf %58, %57 : vector<64x128xf32>
    %60 = arith.mulf %47, %59 : vector<64x128xf32>
    %61 = arith.truncf %39 : vector<64x128xf32> to vector<64x128xbf16>
    %cst_27 = arith.constant dense<0.000000e+00> : vector<64x128xf32>
    %62 = tpu.matmul %61, %41, %cst_27 {dimension_numbers = #tpu.dot_dimension_numbers<[1], [0], [0], [1], [0, 0, 1, 1], [], []>} : vector<64x128xbf16>, vector<128x128xbf16>, vector<64x128xf32> -> vector<64x128xf32>
    %63 = vector.broadcast %43 : vector<1x128xf32> to vector<64x128xf32>
    %64 = arith.addf %62, %63 : vector<64x128xf32>
    %65 = arith.mulf %64, %64 : vector<64x128xf32>
    %66 = arith.mulf %64, %65 : vector<64x128xf32>
    %cst_28 = arith.constant 4.471500e-02 : f32
    %67 = vector.broadcast %cst_28 : f32 to vector<64x128xf32>
    %68 = arith.mulf %67, %66 : vector<64x128xf32>
    %69 = arith.addf %64, %68 : vector<64x128xf32>
    %cst_29 = arith.constant 0.797884583 : f32
    %70 = vector.broadcast %cst_29 : f32 to vector<64x128xf32>
    %71 = arith.mulf %70, %69 : vector<64x128xf32>
    %72 = math.tanh %71 : vector<64x128xf32>
    %cst_30 = arith.constant 1.000000e+00 : f32
    %73 = vector.broadcast %cst_30 : f32 to vector<64x128xf32>
    %74 = arith.addf %73, %72 : vector<64x128xf32>
    %cst_31 = arith.constant 5.000000e-01 : f32
    %75 = vector.broadcast %cst_31 : f32 to vector<64x128xf32>
    %76 = arith.mulf %75, %74 : vector<64x128xf32>
    %77 = arith.mulf %64, %76 : vector<64x128xf32>
    %c2 = arith.constant 2 : index
    %c0_32 = arith.constant 0 : index
    %c0_33 = arith.constant 0 : index
    %78 = vector.load %arg2[%c2, %c0_32, %c0_33] : memref<3x128x128xbf16, #tpu.memory_space<vmem>>, vector<1x128x128xbf16>
    %79 = vector.shape_cast %78 : vector<1x128x128xbf16> to vector<128x128xbf16>
    %c2_34 = arith.constant 2 : index
    %c0_35 = arith.constant 0 : index
    %c0_36 = arith.constant 0 : index
    %80 = vector.load %arg3[%c2_34, %c0_35, %c0_36] : memref<3x1x128xf32, #tpu.memory_space<vmem>>, vector<1x1x128xf32>
    %81 = vector.shape_cast %80 : vector<1x1x128xf32> to vector<1x128xf32>
    %82 = arith.truncf %60 : vector<64x128xf32> to vector<64x128xbf16>
    %cst_37 = arith.constant dense<0.000000e+00> : vector<64x128xf32>
    %83 = tpu.matmul %82, %79, %cst_37 {dimension_numbers = #tpu.dot_dimension_numbers<[1], [0], [0], [1], [0, 0, 1, 1], [], []>} : vector<64x128xbf16>, vector<128x128xbf16>, vector<64x128xf32> -> vector<64x128xf32>
    %84 = vector.broadcast %81 : vector<1x128xf32> to vector<64x128xf32>
    %85 = arith.addf %83, %84 : vector<64x128xf32>
    %86 = arith.truncf %77 : vector<64x128xf32> to vector<64x128xbf16>
    %cst_38 = arith.constant dense<0.000000e+00> : vector<64x128xf32>
    %87 = tpu.matmul %86, %79, %cst_38 {dimension_numbers = #tpu.dot_dimension_numbers<[1], [0], [0], [1], [0, 0, 1, 1], [], []>} : vector<64x128xbf16>, vector<128x128xbf16>, vector<64x128xf32> -> vector<64x128xf32>
    %88 = vector.broadcast %81 : vector<1x128xf32> to vector<64x128xf32>
    %89 = arith.addf %87, %88 : vector<64x128xf32>
    %c0_39 = arith.constant 0 : index
    %c0_40 = arith.constant 0 : index
    %90 = vector.load %arg4[%c0_39, %c0_40] : memref<128x128xf32, #tpu.memory_space<vmem>>, vector<64x128xf32>
    tpu.vector_store %arg4[%c0_39, %c0_40], %85 {strides = array<i32>} : memref<128x128xf32, #tpu.memory_space<vmem>>, vector<64x128xf32>,
    %c64_41 = arith.constant 64 : index
    %c0_42 = arith.constant 0 : index
    %91 = vector.load %arg4[%c64_41, %c0_42] : memref<128x128xf32, #tpu.memory_space<vmem>>, vector<64x128xf32>
    tpu.vector_store %arg4[%c64_41, %c0_42], %89 {strides = array<i32>} : memref<128x128xf32, #tpu.memory_space<vmem>>, vector<64x128xf32>,
    return
  }
  func.func @transform_0(%arg0: i32) -> (i32, i32) {
    %c0_i32 = arith.constant 0 : i32
    %c0_i32_0 = arith.constant 0 : i32
    return %arg0, %c0_i32 : i32, i32
  }
  func.func @transform_1(%arg0: i32) -> (i32, i32, i32) {
    %c0_i32 = arith.constant 0 : i32
    %c0_i32_0 = arith.constant 0 : i32
    %c0_i32_1 = arith.constant 0 : i32
    %c0_i32_2 = arith.constant 0 : i32
    return %c0_i32, %c0_i32_0, %c0_i32_1 : i32, i32, i32
  }
  func.func @transform_2(%arg0: i32) -> (i32, i32, i32) {
    %c0_i32 = arith.constant 0 : i32
    %c0_i32_0 = arith.constant 0 : i32
    %c0_i32_1 = arith.constant 0 : i32
    %c0_i32_2 = arith.constant 0 : i32
    return %c0_i32, %c0_i32_0, %c0_i32_1 : i32, i32, i32
  }
  func.func @transform_3(%arg0: i32) -> (i32, i32) {
    %c0_i32 = arith.constant 0 : i32
    %c0_i32_0 = arith.constant 0 : i32
    return %arg0, %c0_i32 : i32, i32
  }
}

module attributes {stable_mosaic.version = 11 : i64} {
  func.func @_pipeline_kernel(%arg0: i32, %arg1: memref<128x128xf32, #tpu.memory_space<vmem>>, %arg2: memref<3x128x128xbf16, #tpu.memory_space<vmem>>, %arg3: memref<3x1x128xf32, #tpu.memory_space<vmem>>, %arg4: memref<128x128xf32, #tpu.memory_space<vmem>>) attributes {dimension_semantics = [#tpu.dimension_semantics<parallel>], iteration_bounds = array<i64: 1>, scalar_prefetch = 0 : i64, scratch_operands = 0 : i64, tpu.core_type = #tpu.core_type<tc>, window_params = [{transform_indices = @transform_0, window_bounds = array<i64: 128, 128>}, {pipeline_mode = #tpu.pipeline_mode<synchronous>, transform_indices = @transform_1, window_bounds = array<i64: 3, 128, 128>}, {pipeline_mode = #tpu.pipeline_mode<synchronous>, transform_indices = @transform_2, window_bounds = array<i64: 3, 1, 128>}, {transform_indices = @transform_3, window_bounds = array<i64: 128, 128>}]} {
    %c0 = arith.constant 0 : index
    %c0_0 = arith.constant 0 : index
    %0 = vector.load %arg1[%c0, %c0_0] : memref<128x128xf32, #tpu.memory_space<vmem>>, vector<64x128xf32>
    %c64 = arith.constant 64 : index
    %c0_1 = arith.constant 0 : index
    %1 = vector.load %arg1[%c64, %c0_1] : memref<128x128xf32, #tpu.memory_space<vmem>>, vector<64x128xf32>
    %c0_2 = arith.constant 0 : index
    %c0_3 = arith.constant 0 : index
    %c0_4 = arith.constant 0 : index
    %2 = vector.load %arg2[%c0_2, %c0_3, %c0_4] : memref<3x128x128xbf16, #tpu.memory_space<vmem>>, vector<1x128x128xbf16>
    %3 = vector.shape_cast %2 : vector<1x128x128xbf16> to vector<128x128xbf16>
    %c0_5 = arith.constant 0 : index
    %c0_6 = arith.constant 0 : index
    %c0_7 = arith.constant 0 : index
    %4 = vector.load %arg3[%c0_5, %c0_6, %c0_7] : memref<3x1x128xf32, #tpu.memory_space<vmem>>, vector<1x1x128xf32>
    %5 = vector.shape_cast %4 : vector<1x1x128xf32> to vector<1x128xf32>
    %6 = arith.truncf %0 : vector<64x128xf32> to vector<64x128xbf16>
    %cst = arith.constant dense<0.000000e+00> : vector<64x128xf32>
    %7 = tpu.matmul %6, %3, %cst {dimension_numbers = #tpu.dot_dimension_numbers<[1], [0], [0], [1], [0, 0, 1, 1], [], []>} : vector<64x128xbf16>, vector<128x128xbf16>, vector<64x128xf32> -> vector<64x128xf32>
    %8 = vector.broadcast %5 : vector<1x128xf32> to vector<64x128xf32>
    %9 = arith.addf %7, %8 : vector<64x128xf32>
    %10 = arith.mulf %9, %9 : vector<64x128xf32>
    %11 = arith.mulf %9, %10 : vector<64x128xf32>
    %cst_8 = arith.constant 4.471500e-02 : f32
    %12 = vector.broadcast %cst_8 : f32 to vector<64x128xf32>
    %13 = arith.mulf %12, %11 : vector<64x128xf32>
    %14 = arith.addf %9, %13 : vector<64x128xf32>
    %cst_9 = arith.constant 0.797884583 : f32
    %15 = vector.broadcast %cst_9 : f32 to vector<64x128xf32>
    %16 = arith.mulf %15, %14 : vector<64x128xf32>
    %17 = math.tanh %16 : vector<64x128xf32>
    %cst_10 = arith.constant 1.000000e+00 : f32
    %18 = vector.broadcast %cst_10 : f32 to vector<64x128xf32>
    %19 = arith.addf %18, %17 : vector<64x128xf32>
    %cst_11 = arith.constant 5.000000e-01 : f32
    %20 = vector.broadcast %cst_11 : f32 to vector<64x128xf32>
    %21 = arith.mulf %20, %19 : vector<64x128xf32>
    %22 = arith.mulf %9, %21 : vector<64x128xf32>
    %23 = arith.truncf %1 : vector<64x128xf32> to vector<64x128xbf16>
    %cst_12 = arith.constant dense<0.000000e+00> : vector<64x128xf32>
    %24 = tpu.matmul %23, %3, %cst_12 {dimension_numbers = #tpu.dot_dimension_numbers<[1], [0], [0], [1], [0, 0, 1, 1], [], []>} : vector<64x128xbf16>, vector<128x128xbf16>, vector<64x128xf32> -> vector<64x128xf32>
    %25 = vector.broadcast %5 : vector<1x128xf32> to vector<64x128xf32>
    %26 = arith.addf %24, %25 : vector<64x128xf32>
    %27 = arith.mulf %26, %26 : vector<64x128xf32>
    %28 = arith.mulf %26, %27 : vector<64x128xf32>
    %cst_13 = arith.constant 4.471500e-02 : f32
    %29 = vector.broadcast %cst_13 : f32 to vector<64x128xf32>
    %30 = arith.mulf %29, %28 : vector<64x128xf32>
    %31 = arith.addf %26, %30 : vector<64x128xf32>
    %cst_14 = arith.constant 0.797884583 : f32
    %32 = vector.broadcast %cst_14 : f32 to vector<64x128xf32>
    %33 = arith.mulf %32, %31 : vector<64x128xf32>
    %34 = math.tanh %33 : vector<64x128xf32>
    %cst_15 = arith.constant 1.000000e+00 : f32
    %35 = vector.broadcast %cst_15 : f32 to vector<64x128xf32>
    %36 = arith.addf %35, %34 : vector<64x128xf32>
    %cst_16 = arith.constant 5.000000e-01 : f32
    %37 = vector.broadcast %cst_16 : f32 to vector<64x128xf32>
    %38 = arith.mulf %37, %36 : vector<64x128xf32>
    %39 = arith.mulf %26, %38 : vector<64x128xf32>
    %c1 = arith.constant 1 : index
    %c0_17 = arith.constant 0 : index
    %c0_18 = arith.constant 0 : index
    %40 = vector.load %arg2[%c1, %c0_17, %c0_18] : memref<3x128x128xbf16, #tpu.memory_space<vmem>>, vector<1x128x128xbf16>
    %41 = vector.shape_cast %40 : vector<1x128x128xbf16> to vector<128x128xbf16>
    %c1_19 = arith.constant 1 : index
    %c0_20 = arith.constant 0 : index
    %c0_21 = arith.constant 0 : index
    %42 = vector.load %arg3[%c1_19, %c0_20, %c0_21] : memref<3x1x128xf32, #tpu.memory_space<vmem>>, vector<1x1x128xf32>
    %43 = vector.shape_cast %42 : vector<1x1x128xf32> to vector<1x128xf32>
    %44 = arith.truncf %22 : vector<64x128xf32> to vector<64x128xbf16>
    %cst_22 = arith.constant dense<0.000000e+00> : vector<64x128xf32>
    %45 = tpu.matmul %44, %41, %cst_22 {dimension_numbers = #tpu.dot_dimension_numbers<[1], [0], [0], [1], [0, 0, 1, 1], [], []>} : vector<64x128xbf16>, vector<128x128xbf16>, vector<64x128xf32> -> vector<64x128xf32>
    %46 = vector.broadcast %43 : vector<1x128xf32> to vector<64x128xf32>
    %47 = arith.addf %45, %46 : vector<64x128xf32>
    %48 = arith.mulf %47, %47 : vector<64x128xf32>
    %49 = arith.mulf %47, %48 : vector<64x128xf32>
    %cst_23 = arith.constant 4.471500e-02 : f32
    %50 = vector.broadcast %cst_23 : f32 to vector<64x128xf32>
    %51 = arith.mulf %50, %49 : vector<64x128xf32>
    %52 = arith.addf %47, %51 : vector<64x128xf32>
    %cst_24 = arith.constant 0.797884583 : f32
    %53 = vector.broadcast %cst_24 : f32 to vector<64x128xf32>
    %54 = arith.mulf %53, %52 : vector<64x128xf32>
    %55 = math.tanh %54 : vector<64x128xf32>
    %cst_25 = arith.constant 1.000000e+00 : f32
    %56 = vector.broadcast %cst_25 : f32 to vector<64x128xf32>
    %57 = arith.addf %56, %55 : vector<64x128xf32>
    %cst_26 = arith.constant 5.000000e-01 : f32
    %58 = vector.broadcast %cst_26 : f32 to vector<64x128xf32>
    %59 = arith.mulf %58, %57 : vector<64x128xf32>
    %60 = arith.mulf %47, %59 : vector<64x128xf32>
    %61 = arith.truncf %39 : vector<64x128xf32> to vector<64x128xbf16>
    %cst_27 = arith.constant dense<0.000000e+00> : vector<64x128xf32>
    %62 = tpu.matmul %61, %41, %cst_27 {dimension_numbers = #tpu.dot_dimension_numbers<[1], [0], [0], [1], [0, 0, 1, 1], [], []>} : vector<64x128xbf16>, vector<128x128xbf16>, vector<64x128xf32> -> vector<64x128xf32>
    %63 = vector.broadcast %43 : vector<1x128xf32> to vector<64x128xf32>
    %64 = arith.addf %62, %63 : vector<64x128xf32>
    %65 = arith.mulf %64, %64 : vector<64x128xf32>
    %66 = arith.mulf %64, %65 : vector<64x128xf32>
    %cst_28 = arith.constant 4.471500e-02 : f32
    %67 = vector.broadcast %cst_28 : f32 to vector<64x128xf32>
    %68 = arith.mulf %67, %66 : vector<64x128xf32>
    %69 = arith.addf %64, %68 : vector<64x128xf32>
    %cst_29 = arith.constant 0.797884583 : f32
    %70 = vector.broadcast %cst_29 : f32 to vector<64x128xf32>
    %71 = arith.mulf %70, %69 : vector<64x128xf32>
    %72 = math.tanh %71 : vector<64x128xf32>
    %cst_30 = arith.constant 1.000000e+00 : f32
    %73 = vector.broadcast %cst_30 : f32 to vector<64x128xf32>
    %74 = arith.addf %73, %72 : vector<64x128xf32>
    %cst_31 = arith.constant 5.000000e-01 : f32
    %75 = vector.broadcast %cst_31 : f32 to vector<64x128xf32>
    %76 = arith.mulf %75, %74 : vector<64x128xf32>
    %77 = arith.mulf %64, %76 : vector<64x128xf32>
    %c2 = arith.constant 2 : index
    %c0_32 = arith.constant 0 : index
    %c0_33 = arith.constant 0 : index
    %78 = vector.load %arg2[%c2, %c0_32, %c0_33] : memref<3x128x128xbf16, #tpu.memory_space<vmem>>, vector<1x128x128xbf16>
    %79 = vector.shape_cast %78 : vector<1x128x128xbf16> to vector<128x128xbf16>
    %c2_34 = arith.constant 2 : index
    %c0_35 = arith.constant 0 : index
    %c0_36 = arith.constant 0 : index
    %80 = vector.load %arg3[%c2_34, %c0_35, %c0_36] : memref<3x1x128xf32, #tpu.memory_space<vmem>>, vector<1x1x128xf32>
    %81 = vector.shape_cast %80 : vector<1x1x128xf32> to vector<1x128xf32>
    %82 = arith.truncf %60 : vector<64x128xf32> to vector<64x128xbf16>
    %cst_37 = arith.constant dense<0.000000e+00> : vector<64x128xf32>
    %83 = tpu.matmul %82, %79, %cst_37 {dimension_numbers = #tpu.dot_dimension_numbers<[1], [0], [0], [1], [0, 0, 1, 1], [], []>} : vector<64x128xbf16>, vector<128x128xbf16>, vector<64x128xf32> -> vector<64x128xf32>
    %84 = vector.broadcast %81 : vector<1x128xf32> to vector<64x128xf32>
    %85 = arith.addf %83, %84 : vector<64x128xf32>
    %86 = arith.truncf %77 : vector<64x128xf32> to vector<64x128xbf16>
    %cst_38 = arith.constant dense<0.000000e+00> : vector<64x128xf32>
    %87 = tpu.matmul %86, %79, %cst_38 {dimension_numbers = #tpu.dot_dimension_numbers<[1], [0], [0], [1], [0, 0, 1, 1], [], []>} : vector<64x128xbf16>, vector<128x128xbf16>, vector<64x128xf32> -> vector<64x128xf32>
    %88 = vector.broadcast %81 : vector<1x128xf32> to vector<64x128xf32>
    %89 = arith.addf %87, %88 : vector<64x128xf32>
    %c0_39 = arith.constant 0 : index
    %c0_40 = arith.constant 0 : index
    %90 = vector.load %arg4[%c0_39, %c0_40] : memref<128x128xf32, #tpu.memory_space<vmem>>, vector<64x128xf32>
    tpu.vector_store %arg4[%c0_39, %c0_40], %85 {strides = array<i32>} : memref<128x128xf32, #tpu.memory_space<vmem>>, vector<64x128xf32>,
    %c64_41 = arith.constant 64 : index
    %c0_42 = arith.constant 0 : index
    %91 = vector.load %arg4[%c64_41, %c0_42] : memref<128x128xf32, #tpu.memory_space<vmem>>, vector<64x128xf32>
    tpu.vector_store %arg4[%c64_41, %c0_42], %89 {strides = array<i32>} : memref<128x128xf32, #tpu.memory_space<vmem>>, vector<64x128xf32>,
    return
  }
  func.func @transform_0(%arg0: i32) -> (i32, i32) {
    %c0_i32 = arith.constant 0 : i32
    %c0_i32_0 = arith.constant 0 : i32
    return %arg0, %c0_i32 : i32, i32
  }
  func.func @transform_1(%arg0: i32) -> (i32, i32, i32) {
    %c0_i32 = arith.constant 0 : i32
    %c0_i32_0 = arith.constant 0 : i32
    %c0_i32_1 = arith.constant 0 : i32
    %c0_i32_2 = arith.constant 0 : i32
    return %c0_i32, %c0_i32_0, %c0_i32_1 : i32, i32, i32
  }
  func.func @transform_2(%arg0: i32) -> (i32, i32, i32) {
    %c0_i32 = arith.constant 0 : i32
    %c0_i32_0 = arith.constant 0 : i32
    %c0_i32_1 = arith.constant 0 : i32
    %c0_i32_2 = arith.constant 0 : i32
    return %c0_i32, %c0_i32_0, %c0_i32_1 : i32, i32, i32
  }
  func.func @transform_3(%arg0: i32) -> (i32, i32) {
    %c0_i32 = arith.constant 0 : i32
    %c0_i32_0 = arith.constant 0 : i32
    return %arg0, %c0_i32 : i32, i32
  }
}

</mosaic_0001>

<bundles_post_ra>
// kernel: tpu_custom_call.1
= control target key start
LH: loop header
LB: loop body
LE: loop exit
PB: predicated region body
PF: predicated region fallthrough
CT: control target
= control target key end

     0   :  { %8 = vsyncpa [#allocation3], 0  ;;  %s1763_s0 = inlined_call_operand.hbm [shape: f32[128,128], index: 0, kind: input, shape index: {}]   ;;  %s1764_s1 = inlined_call_operand.hbm [shape: bf16[3,128,128], index: 1, kind: input, shape index: {}]   ;;  %s1765_s2 = inlined_call_operand.vmem [shape: f32[3,1,128], index: 2, kind: input, shape index: {}]   ;;  %s1766_s3 = inlined_call_operand.hbm [shape: f32[128,128], index: 3, kind: output, shape index: {}]  }
   0x1   :  { %9 = vsyncpa [#allocation6], 0 }
   0x2   :  { %10 = vsyncpa [#allocation4], 0  ;;  %s1425_s12 = smov [#allocation2]   ;;  %s1353_s16 = scalar_lea.hbm %s1763_s0, 2048 }
   0x3   :  { %s16_s13 = sshll.u32 %s1425_s12, 4  ;;  %p1354_p0 = scmp.ne.s32.totalorder %s1763_s0, %s1353_s16  ;;  %s17_s13 = int_to_ptr.vmem [resolvable:$true] %s16_s13 }
   0x4   :  { %p1357_p1 = scmp.lt.u32.totalorder %s1353_s16, %s1763_s0 }
   0x6   :  { %p1359_p2 = pnand %p1357_p1, %p1354_p0 }
   0x8   :  { %1362 = shalt.err (!%p1359_p2)
}
   0x9   :  { %s1363_s21 = scalar_lea.vmem %s17_s13, 2048  ;;  %p1368_p4 = scmp.lt.s32.totalorder %s17_s13, %s17_s13 }
   0xa   :  { %p1364_p3 = scmp.ne.s32.totalorder %s17_s13, %s1363_s21  ;;  %p1369_p5 = scmp.lt.s32.totalorder %s1363_s21, %s1363_s21 }
   0xc   :  { %p1370_p6 = por %p1369_p5, %p1368_p4 }
   0xe   :  { %p1371_p7 = pnand %p1370_p6, %p1364_p3 }
  0x10   :  { %1374 = shalt.err (!%p1371_p7)
}
  0x11   :  { %s1426_s22 = smov 128   ;;  %s1427_s23 = smov 8  }
  0x12   :  { %22 = dma.hbm_to_vmem [thread:$0]  %s1763_s0, 2048, %s17_s13, [#allocation3], %s1426_s22, %s1426_s22, %s1427_s23  }
  0x13   :  { %s1428_s26 = smov [#allocation5]   ;;  %s1375_s30 = scalar_lea.hbm %s1764_s1, 3072 }
  0x14   :  { %s28_s27 = sshll.u32 %s1428_s26, 4  ;;  %p1376_p8 = scmp.ne.s32.totalorder %s1764_s1, %s1375_s30  ;;  %s29_s27 = int_to_ptr.vmem [resolvable:$true] %s28_s27 }
  0x15   :  { %p1379_p9 = scmp.lt.u32.totalorder %s1375_s30, %s1764_s1 }
  0x17   :  { %p1381_p10 = pnand %p1379_p9, %p1376_p8 }
  0x19   :  { %1384 = shalt.err (!%p1381_p10)
}
  0x1a   :  { %s1385_s8 = scalar_lea.vmem %s29_s27, 3072  ;;  %p1390_p12 = scmp.lt.s32.totalorder %s29_s27, %s29_s27 }
  0x1b   :  { %p1386_p11 = scmp.ne.s32.totalorder %s29_s27, %s1385_s8  ;;  %p1391_p13 = scmp.lt.s32.totalorder %s1385_s8, %s1385_s8 }
  0x1d   :  { %p1392_p0 = por %p1391_p13, %p1390_p12 }
  0x1f   :  { %p1393_p1 = pnand %p1392_p0, %p1386_p11 }
  0x21   :  { %1396 = shalt.err (!%p1393_p1)
}
  0x22   :  { %s1429_s0 = smov 64   ;;  %s1430_s9 = smov 4  }
  0x23   :  { %34 = dma.hbm_to_vmem [thread:$0]  %s1764_s1, 3072, %s29_s27, [#allocation6], %s1429_s0, %s1429_s0, %s1430_s9  }
  0x24   :  { %1419 = dma.done.wait [#allocation3], 2048  }
  0x25   :  { %1420 = vsyncadd [#allocation3], 4294965248 }
  0x26   :  { %1421 = dma.done.wait [#allocation6], 3072  }
  0x27   :  { %1422 = vsyncadd [#allocation6], 4294964224  ;;  %v1265_v0 = vld [vmem:[#allocation5] sm:$0xff]   ;;  %v1266_v1 = vld [vmem:[#allocation5 + $0x8] sm:$0xff]  }
  0x28   :  { %1114 = vmatprep.subr.bf16.mxu0 %v1265_v0  ;;  %1138 = vmatprep.subr.bf16.mxu1 %v1265_v0  ;;  %v1267_v2 = vld [vmem:[#allocation5 + $0x10] sm:$0xff]   ;;  %v1268_v3 = vld [vmem:[#allocation5 + $0x18] sm:$0xff]   ;;  %v44_v4 = vld [vmem:[#allocation2] sm:$0xff] }
  0x29   :  { %1115 = vmatpush3.bf16.msra.mxu0 %v1265_v0  ;;  %1139 = vmatpush3.bf16.msra.mxu1 %v1265_v0  ;;  %v45_v5 = vld [vmem:[#allocation2 + $0x8] sm:$0xff]  ;;  %v52_v6 = vld [vmem:[#allocation2 + $0x40] sm:$0xff]  ;;  %v1271_v12 = vld [vmem:[#allocation5 + $0x30] sm:$0xff]  }
  0x2a   :  { %1116 = vmatprep.subr.bf16.mxu0 %v1266_v1  ;;  %1140 = vmatprep.subr.bf16.mxu1 %v1266_v1  ;;  %v77_v7 = vpack.c.bf16 %v45_v5, %v44_v4  ;;  %v53_v8 = vld [vmem:[#allocation2 + $0x48] sm:$0xff]  ;;  %v1269_v10 = vld [vmem:[#allocation5 + $0x20] sm:$0xff]   ;;  %v1272_v13 = vld [vmem:[#allocation5 + $0x38] sm:$0xff]  }
  0x2b   :  { %v272_v9 = vpack.c.bf16 %v53_v8, %v52_v6  ;;  %v1270_v11 = vld [vmem:[#allocation5 + $0x28] sm:$0xff]   ;;  %v46_v14 = vld [vmem:[#allocation2 + $0x10] sm:$0xff]  ;;  %v47_v15 = vld [vmem:[#allocation2 + $0x18] sm:$0xff] }
  0x2c   :  { %1130 = vmatprep.mubr.bf16.mxu0 %v77_v7  ;;  %v54_v16 = vld [vmem:[#allocation2 + $0x50] sm:$0xff]  ;;  %v55_v17 = vld [vmem:[#allocation2 + $0x58] sm:$0xff]  ;;  %v48_v18 = vld [vmem:[#allocation2 + $0x20] sm:$0xff]  ;;  %v78_v22 = vpack.c.bf16 %v47_v15, %v46_v14 }
  0x2d   :  { %1117 = vmatpush3.bf16.msra.mxu0 %v1266_v1  ;;  %1141 = vmatpush3.bf16.msra.mxu1 %v1266_v1  ;;  %v49_v19 = vld [vmem:[#allocation2 + $0x28] sm:$0xff]  ;;  %v56_v20 = vld [vmem:[#allocation2 + $0x60] sm:$0xff]  ;;  %v273_v23 = vpack.c.bf16 %v55_v17, %v54_v16  ;;  %v50_v26 = vld [vmem:[#allocation2 + $0x30] sm:$0xff] }
  0x2e   :  { %1118 = vmatprep.subr.bf16.mxu0 %v1267_v2  ;;  %1142 = vmatprep.subr.bf16.mxu1 %v1267_v2  ;;  %v57_v21 = vld [vmem:[#allocation2 + $0x68] sm:$0xff]  ;;  %v79_v24 = vpack.c.bf16 %v49_v19, %v48_v18  ;;  %v51_v27 = vld [vmem:[#allocation2 + $0x38] sm:$0xff]  ;;  %v58_v28 = vld [vmem:[#allocation2 + $0x70] sm:$0xff] }
  0x2f   :  { %1154 = vmatprep.mubr.bf16.mxu1 %v272_v9  ;;  %v274_v25 = vpack.c.bf16 %v57_v21, %v56_v20  ;;  %v59_v29 = vld [vmem:[#allocation2 + $0x78] sm:$0xff]  ;;  %v80_v30 = vpack.c.bf16 %v51_v27, %v50_v26  ;;  %v1273_v32 = vld [vmem:[#allocation5 + $0x40] sm:$0xff]   ;;  %v1274_v33 = vld [vmem:[#allocation5 + $0x48] sm:$0xff]  }
  0x30   :  { %v275_v31 = vpack.c.bf16 %v59_v29, %v58_v28  ;;  %v1275_v34 = vld [vmem:[#allocation5 + $0x50] sm:$0xff]   ;;  %v1276_v35 = vld [vmem:[#allocation5 + $0x58] sm:$0xff]   ;;  %v1277_v36 = vld [vmem:[#allocation5 + $0x60] sm:$0xff]  }
  0x31   :  { %1119 = vmatpush3.bf16.msra.mxu0 %v1267_v2  ;;  %1143 = vmatpush3.bf16.msra.mxu1 %v1267_v2  ;;  %v1278_v37 = vld [vmem:[#allocation5 + $0x68] sm:$0xff]   ;;  %v1279_v38 = vld [vmem:[#allocation5 + $0x70] sm:$0xff]   ;;  %v1280_v39 = vld [vmem:[#allocation5 + $0x78] sm:$0xff]  }
  0x32   :  { %1120 = vmatprep.subr.bf16.mxu0 %v1268_v3  ;;  %1144 = vmatprep.subr.bf16.mxu1 %v1268_v3  ;;  %v1482_v40 = vld [vmem:[%s1765_s2] ss:$0 sm:$0xff] }
  0x35   :  { %1121 = vmatpush3.bf16.msra.mxu0 %v1268_v3  ;;  %1145 = vmatpush3.bf16.msra.mxu1 %v1268_v3 }
  0x36   :  { %1122 = vmatprep.subr.bf16.mxu0 %v1269_v10  ;;  %1146 = vmatprep.subr.bf16.mxu1 %v1269_v10 }
  0x39   :  { %1123 = vmatpush3.bf16.msra.mxu0 %v1269_v10  ;;  %1147 = vmatpush3.bf16.msra.mxu1 %v1269_v10 }
  0x3a   :  { %1124 = vmatprep.subr.bf16.mxu0 %v1270_v11  ;;  %1148 = vmatprep.subr.bf16.mxu1 %v1270_v11 }
  0x3d   :  { %1125 = vmatpush3.bf16.msra.mxu0 %v1270_v11  ;;  %1149 = vmatpush3.bf16.msra.mxu1 %v1270_v11 }
  0x3e   :  { %1126 = vmatprep.subr.bf16.mxu0 %v1271_v12  ;;  %1150 = vmatprep.subr.bf16.mxu1 %v1271_v12 }
  0x41   :  { %1127 = vmatpush3.bf16.msra.mxu0 %v1271_v12  ;;  %1151 = vmatpush3.bf16.msra.mxu1 %v1271_v12 }
  0x42   :  { %1128 = vmatprep.subr.bf16.mxu0 %v1272_v13  ;;  %1152 = vmatprep.subr.bf16.mxu1 %v1272_v13 }
  0x45   :  { %1129 = vmatpush3.bf16.msra.mxu0 %v1272_v13  ;;  %1153 = vmatpush3.bf16.msra.mxu1 %v1272_v13 }
  0x46   :  { %1162 = vmatprep.subr.bf16.mxu0 %v1273_v32  ;;  %1186 = vmatprep.subr.bf16.mxu1 %v1273_v32 }
  0x48   :  { %1131 = vmatmul.mubr.bf16.vlgmr.msra.gmra.mrb[0].mxu0 %v78_v22  ;;  %1155 = vmatmul.mubr.bf16.vlgmr.msra.gmra.mrb[0].mxu1 %v273_v23 }
  0x49   :  { %1134 = vmatprep.mubr.bf16.mxu0 %v79_v24  ;;  %1158 = vmatprep.mubr.bf16.mxu1 %v274_v25 }
  0x4a   :  { %1163 = vmatpush3.bf16.msra.mxu0 %v1273_v32  ;;  %1187 = vmatpush3.bf16.msra.mxu1 %v1273_v32 }
  0x4b   :  { %1164 = vmatprep.subr.bf16.mxu0 %v1274_v33  ;;  %1188 = vmatprep.subr.bf16.mxu1 %v1274_v33 }
  0x4e   :  { %1165 = vmatpush3.bf16.msra.mxu0 %v1274_v33  ;;  %1189 = vmatpush3.bf16.msra.mxu1 %v1274_v33 }
  0x4f   :  { %1166 = vmatprep.subr.bf16.mxu0 %v1275_v34  ;;  %1190 = vmatprep.subr.bf16.mxu1 %v1275_v34 }
  0x50   :  { %1135 = vmatmul.mubr.bf16.gmra.mrb[4].mxu0 %v80_v30  ;;  %1159 = vmatmul.mubr.bf16.gmra.mrb[4].mxu1 %v275_v31 }
  0x52   :  { %1167 = vmatpush3.bf16.msra.mxu0 %v1275_v34  ;;  %1191 = vmatpush3.bf16.msra.mxu1 %v1275_v34 }
  0x53   :  { %1168 = vmatprep.subr.bf16.mxu0 %v1276_v35  ;;  %1192 = vmatprep.subr.bf16.mxu1 %v1276_v35 }
  0x56   :  { %1169 = vmatpush3.bf16.msra.mxu0 %v1276_v35  ;;  %1193 = vmatpush3.bf16.msra.mxu1 %v1276_v35 }
  0x57   :  { %1170 = vmatprep.subr.bf16.mxu0 %v1277_v36  ;;  %1194 = vmatprep.subr.bf16.mxu1 %v1277_v36 }
  0x5a   :  { %1171 = vmatpush3.bf16.msra.mxu0 %v1277_v36  ;;  %1195 = vmatpush3.bf16.msra.mxu1 %v1277_v36 }
  0x5b   :  { %1172 = vmatprep.subr.bf16.mxu0 %v1278_v37  ;;  %1196 = vmatprep.subr.bf16.mxu1 %v1278_v37 }
  0x5e   :  { %1173 = vmatpush3.bf16.msra.mxu0 %v1278_v37  ;;  %1197 = vmatpush3.bf16.msra.mxu1 %v1278_v37 }
  0x5f   :  { %1174 = vmatprep.subr.bf16.mxu0 %v1279_v38  ;;  %1198 = vmatprep.subr.bf16.mxu1 %v1279_v38 }
  0x62   :  { %1175 = vmatpush3.bf16.msra.mxu0 %v1279_v38  ;;  %1199 = vmatpush3.bf16.msra.mxu1 %v1279_v38 }
  0x63   :  { %1176 = vmatprep.subr.bf16.mxu0 %v1280_v39  ;;  %1200 = vmatprep.subr.bf16.mxu1 %v1280_v39 }
  0x66   :  { %1177 = vmatpush3.bf16.msra.mxu0 %v1280_v39  ;;  %1201 = vmatpush3.bf16.msra.mxu1 %v1280_v39 }
 0x11b   :  { %v1132_v41 = vpop.f32.mrb[0].mxu0  ;;  %v1156_v42 = vpop.f32.mrb[0].mxu1 }
 0x11c   :  { %v1485_v43 = vadd.f32 %v1132_v41, %v1482_v40  ;;  %v1488_v44 = vadd.f32 %v1156_v42, %v1482_v40  ;;  %v169_v45 = vpop.f32.mrb[1].mxu0  ;;  %v310_v46 = vpop.f32.mrb[1].mxu1 }
 0x11d   :  { %v1491_v47 = vadd.f32 %v1482_v40, %v169_v45  ;;  %v1494_v48 = vadd.f32 %v1482_v40, %v310_v46  ;;  %v1133_v49 = vpop.f32.mrb[2].mxu0  ;;  %v1157_v50 = vpop.f32.mrb[2].mxu1 }
 0x11e   :  { %v202_v51 = vmul.f32 %v1485_v43, %v1485_v43  ;;  %v343_v52 = vmul.f32 %v1488_v44, %v1488_v44  ;;  %v1501_v53 = vadd.f32 %v1133_v49, %v1482_v40  ;;  %v1504_v54 = vadd.f32 %v1157_v50, %v1482_v40  ;;  %v172_v55 = vpop.f32.mrb[3].mxu0  ;;  %v313_v56 = vpop.f32.mrb[3].mxu1 }
 0x11f   :  { %v200_v57 = vmul.f32 %v1491_v47, %v1491_v47  ;;  %v341_v58 = vmul.f32 %v1494_v48, %v1494_v48  ;;  %v1511_v59 = vadd.f32 %v1482_v40, %v172_v55  ;;  %v1514_v60 = vadd.f32 %v1482_v40, %v313_v56 }
 0x120   :  { %v210_v61 = vmul.f32 %v202_v51, %v1485_v43  ;;  %v351_v62 = vmul.f32 %v343_v52, %v1488_v44  ;;  %v203_v63 = vmul.f32 %v1501_v53, %v1501_v53  ;;  %v344_v0 = vmul.f32 %v1504_v54, %v1504_v54 }
 0x121   :  { %v208_v1 = vmul.f32 %v200_v57, %v1491_v47  ;;  %v349_v2 = vmul.f32 %v341_v58, %v1494_v48  ;;  %v201_v3 = vmul.f32 %v1511_v59, %v1511_v59  ;;  %v342_v4 = vmul.f32 %v1514_v60, %v1514_v60 }
 0x122   :  { %v218_v5 = vmul.f32 0.044715, %v210_v61  ;;  %v359_v6 = vmul.f32 0.044715, %v351_v62  ;;  %v211_v7 = vmul.f32 %v203_v63, %v1501_v53  ;;  %v352_v8 = vmul.f32 %v344_v0, %v1504_v54 }
 0x123   :  { %v216_v9 = vmul.f32 0.044715, %v208_v1  ;;  %v357_v10 = vmul.f32 0.044715, %v349_v2  ;;  %v209_v11 = vmul.f32 %v201_v3, %v1511_v59  ;;  %v350_v12 = vmul.f32 %v342_v4, %v1514_v60  ;;  %v1136_v13 = vpop.f32.mrb[4].mxu0  ;;  %v1160_v14 = vpop.f32.mrb[4].mxu1 }
 0x124   :  { %v226_v15 = vadd.f32 %v218_v5, %v1485_v43  ;;  %v367_v16 = vadd.f32 %v359_v6, %v1488_v44  ;;  %v219_v17 = vmul.f32 0.044715, %v211_v7  ;;  %v360_v18 = vmul.f32 0.044715, %v352_v8  ;;  %v185_v19 = vpop.f32.mrb[5].mxu0  ;;  %v326_v20 = vpop.f32.mrb[5].mxu1 }
 0x125   :  { %v224_v21 = vadd.f32 %v216_v9, %v1491_v47  ;;  %v365_v22 = vadd.f32 %v357_v10, %v1494_v48  ;;  %v217_v23 = vmul.f32 0.044715, %v209_v11  ;;  %v358_v24 = vmul.f32 0.044715, %v350_v12  ;;  %v1137_v25 = vpop.f32.mrb[6].mxu0  ;;  %v1161_v26 = vpop.f32.mrb[6].mxu1 }
 0x126   :  { %v234_v27 = vmul.f32 0.7978846, %v226_v15  ;;  %v375_v28 = vmul.f32 0.7978846, %v367_v16  ;;  %v227_v29 = vadd.f32 %v219_v17, %v1501_v53  ;;  %v368_v30 = vadd.f32 %v360_v18, %v1504_v54  ;;  %v188_v31 = vpop.f32.mrb[7].mxu0  ;;  %v329_v32 = vpop.f32.mrb[7].mxu1 }
 0x127   :  { %v232_v33 = vmul.f32 0.7978846, %v224_v21  ;;  %v373_v34 = vmul.f32 0.7978846, %v365_v22  ;;  %v225_v35 = vadd.f32 %v217_v23, %v1511_v59  ;;  %v366_v36 = vadd.f32 %v358_v24, %v1514_v60 }
 0x128   :  { %1289 = vtanh.f32 %v234_v27  ;;  %v235_v37 = vmul.f32 0.7978846, %v227_v29  ;;  %v376_v38 = vmul.f32 0.7978846, %v368_v30  ;;  %v1541_v39 = vadd.f32 %v1136_v13, %v1482_v40 }
 0x129   :  { %1291 = vtanh.f32 %v375_v28  ;;  %v233_v41 = vmul.f32 0.7978846, %v225_v35  ;;  %v374_v42 = vmul.f32 0.7978846, %v366_v36  ;;  %v1544_v45 = vadd.f32 %v1160_v14, %v1482_v40 }
 0x12a   :  { %1293 = vtanh.f32 %v232_v33  ;;  %v206_v46 = vmul.f32 %v1541_v39, %v1541_v39  ;;  %v1549_v49 = vadd.f32 %v1482_v40, %v185_v19  ;;  %v1552_v50 = vadd.f32 %v1482_v40, %v326_v20 }
 0x12b   :  { %1295 = vtanh.f32 %v373_v34  ;;  %v347_v51 = vmul.f32 %v1544_v45, %v1544_v45  ;;  %v1557_v52 = vadd.f32 %v1137_v25, %v1482_v40  ;;  %v1560_v55 = vadd.f32 %v1161_v26, %v1482_v40 }
 0x12c   :  { %1297 = vtanh.f32 %v235_v37  ;;  %v214_v56 = vmul.f32 %v206_v46, %v1541_v39  ;;  %v204_v57 = vmul.f32 %v1549_v49, %v1549_v49  ;;  %v345_v58 = vmul.f32 %v1552_v50, %v1552_v50 }
 0x12d   :  { %1299 = vtanh.f32 %v376_v38  ;;  %v355_v61 = vmul.f32 %v347_v51, %v1544_v45  ;;  %v207_v62 = vmul.f32 %v1557_v52, %v1557_v52  ;;  %v348_v63 = vmul.f32 %v1560_v55, %v1560_v55 }
 0x12e   :  { %1301 = vtanh.f32 %v233_v41  ;;  %v222_v0 = vmul.f32 0.044715, %v214_v56  ;;  %v212_v1 = vmul.f32 %v204_v57, %v1549_v49  ;;  %v353_v2 = vmul.f32 %v345_v58, %v1552_v50 }
 0x12f   :  { %1303 = vtanh.f32 %v374_v42  ;;  %v363_v3 = vmul.f32 0.044715, %v355_v61  ;;  %v215_v4 = vmul.f32 %v207_v62, %v1557_v52  ;;  %v356_v5 = vmul.f32 %v348_v63, %v1560_v55 }
 0x130   :  { %v230_v6 = vadd.f32 %v222_v0, %v1541_v39  ;;  %v220_v7 = vmul.f32 0.044715, %v212_v1  ;;  %v361_v8 = vmul.f32 0.044715, %v353_v2  ;;  %v1578_v9 = vadd.f32 %v1482_v40, %v188_v31 }
 0x131   :  { %v371_v10 = vadd.f32 %v363_v3, %v1544_v45  ;;  %v223_v11 = vmul.f32 0.044715, %v215_v4  ;;  %v364_v12 = vmul.f32 0.044715, %v356_v5  ;;  %v1582_v13 = vadd.f32 %v1482_v40, %v329_v32 }
 0x132   :  { %v1290_v14 = vpop.eup %1289  ;;  %v238_v15 = vmul.f32 0.7978846, %v230_v6  ;;  %v228_v16 = vadd.f32 %v220_v7, %v1549_v49  ;;  %v369_v17 = vadd.f32 %v361_v8, %v1552_v50  ;;  %v205_v18 = vmul.f32 %v1578_v9, %v1578_v9 }
 0x133   :  { %v1292_v19 = vpop.eup %1291  ;;  %v250_v20 = vadd.f32 1.0, %v1290_v14  ;;  %v379_v21 = vmul.f32 0.7978846, %v371_v10  ;;  %v231_v22 = vadd.f32 %v223_v11, %v1557_v52  ;;  %v372_v23 = vadd.f32 %v364_v12, %v1560_v55 }
 0x134   :  { %v1294_v24 = vpop.eup %1293  ;;  %v391_v25 = vadd.f32 1.0, %v1292_v19  ;;  %1305 = vtanh.f32 %v238_v15  ;;  %v236_v40 = vmul.f32 0.7978846, %v228_v16  ;;  %v377_v26 = vmul.f32 0.7978846, %v369_v17 }
 0x135   :  { %v1296_v27 = vpop.eup %1295  ;;  %v258_v28 = vmul.f32 0.5, %v250_v20  ;;  %1307 = vtanh.f32 %v379_v21  ;;  %v239_v29 = vmul.f32 0.7978846, %v231_v22  ;;  %v380_v30 = vmul.f32 0.7978846, %v372_v23 }
 0x136   :  { %v1298_v31 = vpop.eup %1297  ;;  %v399_v32 = vmul.f32 0.5, %v391_v25  ;;  %1309 = vtanh.f32 %v236_v40  ;;  %v213_v33 = vmul.f32 %v205_v18, %v1578_v9  ;;  %v346_v34 = vmul.f32 %v1582_v13, %v1582_v13 }
 0x137   :  { %v1300_v35 = vpop.eup %1299  ;;  %v266_v36 = vmul.f32 %v258_v28, %v1485_v43  ;;  %v251_v37 = vadd.f32 1.0, %v1298_v31  ;;  %1311 = vtanh.f32 %v377_v26  ;;  %v248_v38 = vadd.f32 1.0, %v1294_v24 }
 0x138   :  { %v1302_v41 = vpop.eup %1301  ;;  %v407_v42 = vmul.f32 %v399_v32, %v1488_v44  ;;  %v392_v46 = vadd.f32 1.0, %v1300_v35  ;;  %1313 = vtanh.f32 %v239_v29  ;;  %v221_v51 = vmul.f32 0.044715, %v213_v33 }
 0x139   :  { %v1304_v56 = vpop.eup %1303  ;;  %v259_v57 = vmul.f32 0.5, %v251_v37  ;;  %1315 = vtanh.f32 %v380_v30  ;;  %v354_v58 = vmul.f32 %v346_v34, %v1582_v13  ;;  %v249_v61 = vadd.f32 1.0, %v1302_v41 }
 0x13a   :  { %v400_v62 = vmul.f32 0.5, %v392_v46  ;;  %v229_v63 = vadd.f32 %v221_v51, %v1578_v9  ;;  %v256_v0 = vmul.f32 0.5, %v248_v38  ;;  %v389_v43 = vadd.f32 1.0, %v1296_v27 }
 0x13b   :  { %v267_v1 = vmul.f32 %v259_v57, %v1501_v53  ;;  %v362_v2 = vmul.f32 0.044715, %v354_v58  ;;  %v257_v3 = vmul.f32 0.5, %v249_v61  ;;  %v390_v4 = vadd.f32 1.0, %v1304_v56  ;;  %v1281_v58 = vld [vmem:[#allocation5 + $0x80] sm:$0xff]   ;;  %v1282_v61 = vld [vmem:[#allocation5 + $0x88] sm:$0xff]  }
 0x13c   :  { %v408_v44 = vmul.f32 %v400_v62, %v1504_v54  ;;  %v237_v5 = vmul.f32 0.7978846, %v229_v63  ;;  %v264_v6 = vmul.f32 %v256_v0, %v1491_v47  ;;  %v397_v7 = vmul.f32 0.5, %v389_v43  ;;  %1210 = vmatprep.subr.bf16.mxu0 %v1281_v58  ;;  %1234 = vmatprep.subr.bf16.mxu1 %v1281_v58  ;;  %v1287_v62 = vld [vmem:[#allocation5 + $0xb0] sm:$0xff]   ;;  %v1288_v63 = vld [vmem:[#allocation5 + $0xb8] sm:$0xff]  }
 0x13d   :  { %v433_v8 = vpack.c.bf16 %v267_v1, %v266_v36  ;;  %v370_v10 = vadd.f32 %v362_v2, %v1582_v13  ;;  %v265_v11 = vmul.f32 %v257_v3, %v1511_v59  ;;  %v398_v12 = vmul.f32 0.5, %v390_v4  ;;  %v1615_v0 = vld [vmem:[%s1765_s2 + $0x1] ss:$0 sm:$0xff] }
 0x13e   :  { %v1306_v14 = vpop.eup %1305  ;;  %v628_v15 = vpack.c.bf16 %v408_v44, %v407_v42  ;;  %1317 = vtanh.f32 %v237_v5  ;;  %v405_v53 = vmul.f32 %v397_v7, %v1494_v48 }
 0x13f   :  { %v1308_v16 = vpop.eup %1307  ;;  %v378_v17 = vmul.f32 0.7978846, %v370_v10  ;;  %v432_v18 = vpack.c.bf16 %v265_v11, %v264_v6  ;;  %v406_v54 = vmul.f32 %v398_v12, %v1514_v60  ;;  %v254_v19 = vadd.f32 1.0, %v1306_v14 }
 0x140   :  { %v1310_v20 = vpop.eup %1309  ;;  %v395_v47 = vadd.f32 1.0, %v1308_v16 }
 0x141   :  { %v1312_v21 = vpop.eup %1311  ;;  %1319 = vtanh.f32 %v378_v17  ;;  %1178 = vmatprep.mubr.bf16.mxu0 %v432_v18  ;;  %v627_v22 = vpack.c.bf16 %v406_v54, %v405_v53  ;;  %v262_v25 = vmul.f32 0.5, %v254_v19  ;;  %v252_v26 = vadd.f32 1.0, %v1310_v20 }
 0x142   :  { %v1314_v23 = vpop.eup %1313  ;;  %1179 = vmatmul.mubr.bf16.vlgmr.msra.gmra.mrb[8].mxu0 %v433_v8  ;;  %v403_v40 = vmul.f32 0.5, %v395_v47  ;;  %v393_v31 = vadd.f32 1.0, %v1312_v21 }
 0x143   :  { %v1316_v59 = vpop.eup %1315  ;;  %1202 = vmatprep.mubr.bf16.mxu1 %v627_v22  ;;  %v255_v24 = vadd.f32 1.0, %v1314_v23  ;;  %v270_v60 = vmul.f32 %v262_v25, %v1541_v39  ;;  %v260_v35 = vmul.f32 0.5, %v252_v26  ;;  %1211 = vmatpush3.bf16.msra.mxu0 %v1281_v58 }
 0x144   :  { %1203 = vmatmul.mubr.bf16.vlgmr.msra.gmra.mrb[8].mxu1 %v628_v15  ;;  %v396_v48 = vadd.f32 1.0, %v1316_v59  ;;  %v411_v32 = vmul.f32 %v403_v40, %v1544_v45  ;;  %v401_v46 = vmul.f32 0.5, %v393_v31  ;;  %1212 = vmatprep.subr.bf16.mxu0 %v1282_v61 }
 0x145   :  { %v263_v27 = vmul.f32 0.5, %v255_v24  ;;  %v268_v51 = vmul.f32 %v260_v35, %v1549_v49  ;;  %1235 = vmatpush3.bf16.msra.mxu1 %v1281_v58  ;;  %v1283_v49 = vld [vmem:[#allocation5 + $0x90] sm:$0xff]  }
 0x146   :  { %v404_v28 = vmul.f32 0.5, %v396_v48  ;;  %v409_v57 = vmul.f32 %v401_v46, %v1552_v50  ;;  %1236 = vmatprep.subr.bf16.mxu1 %v1282_v61  ;;  %v1284_v50 = vld [vmem:[#allocation5 + $0x98] sm:$0xff]  }
 0x147   :  { %v271_v29 = vmul.f32 %v263_v27, %v1557_v52  ;;  %1213 = vmatpush3.bf16.msra.mxu0 %v1282_v61 }
 0x148   :  { %v1318_v30 = vpop.eup %1317  ;;  %v412_v33 = vmul.f32 %v404_v28, %v1560_v55  ;;  %1214 = vmatprep.subr.bf16.mxu0 %v1283_v49 }
 0x149   :  { %v253_v34 = vadd.f32 1.0, %v1318_v30  ;;  %v435_v36 = vpack.c.bf16 %v271_v29, %v270_v60  ;;  %1237 = vmatpush3.bf16.msra.mxu1 %v1282_v61 }
 0x14a   :  { %v630_v37 = vpack.c.bf16 %v412_v33, %v411_v32  ;;  %1238 = vmatprep.subr.bf16.mxu1 %v1283_v49 }
 0x14b   :  { %v1320_v38 = vpop.eup %1319  ;;  %v261_v41 = vmul.f32 0.5, %v253_v34  ;;  %1215 = vmatpush3.bf16.msra.mxu0 %v1283_v49 }
 0x14c   :  { %v394_v42 = vadd.f32 1.0, %v1320_v38  ;;  %1216 = vmatprep.subr.bf16.mxu0 %v1284_v50 }
 0x14d   :  { %v269_v39 = vmul.f32 %v261_v41, %v1578_v9  ;;  %1239 = vmatpush3.bf16.msra.mxu1 %v1283_v49  ;;  %v1285_v9 = vld [vmem:[#allocation5 + $0xa0] sm:$0xff]  }
 0x14e   :  { %v402_v56 = vmul.f32 0.5, %v394_v42  ;;  %1240 = vmatprep.subr.bf16.mxu1 %v1284_v50 }
 0x14f   :  { %v434_v52 = vpack.c.bf16 %v269_v39, %v268_v51  ;;  %1217 = vmatpush3.bf16.msra.mxu0 %v1284_v50 }
 0x150   :  { %v410_v45 = vmul.f32 %v402_v56, %v1582_v13  ;;  %1218 = vmatprep.subr.bf16.mxu0 %v1285_v9  ;;  %v1286_v13 = vld [vmem:[#allocation5 + $0xa8] sm:$0xff]  }
 0x151   :  { %1182 = vmatprep.mubr.bf16.mxu0 %v434_v52  ;;  %1241 = vmatpush3.bf16.msra.mxu1 %v1284_v50 }
 0x152   :  { %v629_v55 = vpack.c.bf16 %v410_v45, %v409_v57  ;;  %1183 = vmatmul.mubr.bf16.gmra.mrb[12].mxu0 %v435_v36  ;;  %1242 = vmatprep.subr.bf16.mxu1 %v1285_v9 }
 0x153   :  { %1219 = vmatpush3.bf16.msra.mxu0 %v1285_v9 }
 0x154   :  { %1206 = vmatprep.mubr.bf16.mxu1 %v629_v55  ;;  %1220 = vmatprep.subr.bf16.mxu0 %v1286_v13 }
 0x155   :  { %1207 = vmatmul.mubr.bf16.gmra.mrb[12].mxu1 %v630_v37 }
 0x156   :  { %1243 = vmatpush3.bf16.msra.mxu1 %v1285_v9 }
 0x157   :  { %1244 = vmatprep.subr.bf16.mxu1 %v1286_v13  ;;  %1221 = vmatpush3.bf16.msra.mxu0 %v1286_v13 }
 0x158   :  { %1222 = vmatprep.subr.bf16.mxu0 %v1287_v62 }
 0x15a   :  { %1245 = vmatpush3.bf16.msra.mxu1 %v1286_v13 }
 0x15b   :  { %1246 = vmatprep.subr.bf16.mxu1 %v1287_v62  ;;  %1223 = vmatpush3.bf16.msra.mxu0 %v1287_v62 }
 0x15c   :  { %1224 = vmatprep.subr.bf16.mxu0 %v1288_v63 }
 0x15e   :  { %1247 = vmatpush3.bf16.msra.mxu1 %v1287_v62 }
 0x15f   :  { %1248 = vmatprep.subr.bf16.mxu1 %v1288_v63  ;;  %1225 = vmatpush3.bf16.msra.mxu0 %v1288_v63 }
 0x162   :  { %1249 = vmatpush3.bf16.msra.mxu1 %v1288_v63 }
 0x215   :  { %v1180_v43 = vpop.f32.mrb[8].mxu0 }
 0x216   :  { %v1618_v1 = vadd.f32 %v1180_v43, %v1615_v0  ;;  %v524_v2 = vpop.f32.mrb[9].mxu0 }
 0x217   :  { %v1204_v3 = vpop.f32.mrb[8].mxu1  ;;  %v1621_v4 = vadd.f32 %v1615_v0, %v524_v2  ;;  %v1181_v44 = vpop.f32.mrb[10].mxu0 }
 0x218   :  { %v557_v5 = vmul.f32 %v1618_v1, %v1618_v1  ;;  %v1626_v6 = vadd.f32 %v1204_v3, %v1615_v0  ;;  %v665_v7 = vpop.f32.mrb[9].mxu1  ;;  %v1629_v8 = vadd.f32 %v1181_v44, %v1615_v0  ;;  %v527_v10 = vpop.f32.mrb[11].mxu0 }
 0x219   :  { %v555_v11 = vmul.f32 %v1621_v4, %v1621_v4  ;;  %v1634_v12 = vadd.f32 %v1615_v0, %v665_v7  ;;  %v1205_v14 = vpop.f32.mrb[10].mxu1  ;;  %v1637_v15 = vadd.f32 %v1615_v0, %v527_v10 }
 0x21a   :  { %v565_v53 = vmul.f32 %v557_v5, %v1618_v1  ;;  %v698_v16 = vmul.f32 %v1626_v6, %v1626_v6  ;;  %v558_v17 = vmul.f32 %v1629_v8, %v1629_v8  ;;  %v1645_v18 = vadd.f32 %v1205_v14, %v1615_v0  ;;  %v668_v54 = vpop.f32.mrb[11].mxu1 }
 0x21b   :  { %v563_v19 = vmul.f32 %v555_v11, %v1621_v4  ;;  %v696_v20 = vmul.f32 %v1634_v12, %v1634_v12  ;;  %v556_v47 = vmul.f32 %v1637_v15, %v1637_v15  ;;  %v1653_v21 = vadd.f32 %v1615_v0, %v668_v54 }
 0x21c   :  { %v573_v22 = vmul.f32 0.044715, %v565_v53  ;;  %v706_v23 = vmul.f32 %v698_v16, %v1626_v6  ;;  %v566_v59 = vmul.f32 %v558_v17, %v1629_v8  ;;  %v699_v24 = vmul.f32 %v1645_v18, %v1645_v18 }
 0x21d   :  { %v571_v25 = vmul.f32 0.044715, %v563_v19  ;;  %v704_v48 = vmul.f32 %v696_v20, %v1634_v12  ;;  %v564_v40 = vmul.f32 %v556_v47, %v1637_v15  ;;  %v697_v26 = vmul.f32 %v1653_v21, %v1653_v21 }
 0x21e   :  { %v581_v27 = vadd.f32 %v573_v22, %v1618_v1  ;;  %v714_v28 = vmul.f32 0.044715, %v706_v23  ;;  %v574_v60 = vmul.f32 0.044715, %v566_v59  ;;  %v707_v29 = vmul.f32 %v699_v24, %v1645_v18 }
 0x21f   :  { %v579_v30 = vadd.f32 %v571_v25, %v1621_v4  ;;  %v712_v31 = vmul.f32 0.044715, %v704_v48  ;;  %v572_v32 = vmul.f32 0.044715, %v564_v40  ;;  %v705_v33 = vmul.f32 %v697_v26, %v1653_v21 }
 0x220   :  { %v589_v34 = vmul.f32 0.7978846, %v581_v27  ;;  %v722_v35 = vadd.f32 %v714_v28, %v1626_v6  ;;  %v582_v36 = vadd.f32 %v574_v60, %v1629_v8  ;;  %v715_v37 = vmul.f32 0.044715, %v707_v29 }
 0x221   :  { %v587_v38 = vmul.f32 0.7978846, %v579_v30  ;;  %v720_v41 = vadd.f32 %v712_v31, %v1634_v12  ;;  %v580_v42 = vadd.f32 %v572_v32, %v1637_v15  ;;  %v713_v46 = vmul.f32 0.044715, %v705_v33 }
 0x222   :  { %1321 = vtanh.f32 %v589_v34  ;;  %v730_v51 = vmul.f32 0.7978846, %v722_v35  ;;  %v590_v39 = vmul.f32 0.7978846, %v582_v36  ;;  %v723_v56 = vadd.f32 %v715_v37, %v1645_v18 }
 0x223   :  { %v721_v52 = vadd.f32 %v713_v46, %v1653_v21  ;;  %v728_v57 = vmul.f32 0.7978846, %v720_v41  ;;  %v588_v55 = vmul.f32 0.7978846, %v580_v42 }
 0x224   :  { %1323 = vtanh.f32 %v730_v51  ;;  %v731_v45 = vmul.f32 0.7978846, %v723_v56 }
 0x225   :  { %1325 = vtanh.f32 %v587_v38  ;;  %v1184_v58 = vpop.f32.mrb[12].mxu0  ;;  %v729_v61 = vmul.f32 0.7978846, %v721_v52 }
 0x226   :  { %1327 = vtanh.f32 %v590_v39  ;;  %v1674_v49 = vadd.f32 %v1184_v58, %v1615_v0  ;;  %v540_v50 = vpop.f32.mrb[13].mxu0 }
 0x227   :  { %1329 = vtanh.f32 %v731_v45  ;;  %v1677_v9 = vadd.f32 %v1615_v0, %v540_v50  ;;  %v1185_v13 = vpop.f32.mrb[14].mxu0 }
 0x228   :  { %1331 = vtanh.f32 %v728_v57  ;;  %v561_v62 = vmul.f32 %v1674_v49, %v1674_v49  ;;  %v1208_v63 = vpop.f32.mrb[12].mxu1  ;;  %v1682_v43 = vadd.f32 %v1185_v13, %v1615_v0  ;;  %v543_v2 = vpop.f32.mrb[15].mxu0 }
 0x229   :  { %1333 = vtanh.f32 %v588_v55  ;;  %v1685_v3 = vadd.f32 %v1208_v63, %v1615_v0  ;;  %v559_v44 = vmul.f32 %v1677_v9, %v1677_v9  ;;  %v681_v5 = vpop.f32.mrb[13].mxu1  ;;  %v1690_v7 = vadd.f32 %v1615_v0, %v543_v2 }
 0x22a   :  { %1335 = vtanh.f32 %v729_v61  ;;  %v569_v10 = vmul.f32 %v561_v62, %v1674_v49  ;;  %v1694_v11 = vadd.f32 %v1615_v0, %v681_v5  ;;  %v562_v14 = vmul.f32 %v1682_v43, %v1682_v43  ;;  %v1209_v53 = vpop.f32.mrb[14].mxu1 }
 0x22b   :  { %v702_v16 = vmul.f32 %v1685_v3, %v1685_v3  ;;  %v567_v17 = vmul.f32 %v559_v44, %v1677_v9  ;;  %v1702_v54 = vadd.f32 %v1209_v53, %v1615_v0  ;;  %v560_v19 = vmul.f32 %v1690_v7, %v1690_v7  ;;  %v684_v20 = vpop.f32.mrb[15].mxu1 }
 0x22c   :  { %v1322_v47 = vpop.eup %1321  ;;  %v577_v22 = vmul.f32 0.044715, %v569_v10  ;;  %v700_v23 = vmul.f32 %v1694_v11, %v1694_v11  ;;  %v570_v59 = vmul.f32 %v562_v14, %v1682_v43  ;;  %v1710_v24 = vadd.f32 %v1615_v0, %v684_v20 }
 0x22d   :  { %v605_v25 = vadd.f32 1.0, %v1322_v47  ;;  %v710_v48 = vmul.f32 %v702_v16, %v1685_v3  ;;  %v575_v40 = vmul.f32 0.044715, %v567_v17  ;;  %v703_v26 = vmul.f32 %v1702_v54, %v1702_v54 }
 0x22e   :  { %v1324_v27 = vpop.eup %1323  ;;  %v585_v28 = vadd.f32 %v577_v22, %v1674_v49  ;;  %v708_v60 = vmul.f32 %v700_v23, %v1694_v11  ;;  %v578_v29 = vmul.f32 0.044715, %v570_v59  ;;  %v568_v30 = vmul.f32 %v560_v19, %v1690_v7 }
 0x22f   :  { %v1326_v31 = vpop.eup %1325  ;;  %v613_v32 = vmul.f32 0.5, %v605_v25  ;;  %v746_v33 = vadd.f32 1.0, %v1324_v27  ;;  %v718_v0 = vmul.f32 0.044715, %v710_v48  ;;  %v583_v34 = vadd.f32 %v575_v40, %v1677_v9 }
 0x230   :  { %v1328_v35 = vpop.eup %1327  ;;  %v593_v36 = vmul.f32 0.7978846, %v585_v28  ;;  %v716_v37 = vmul.f32 0.044715, %v708_v60  ;;  %v586_v38 = vadd.f32 %v578_v29, %v1682_v43  ;;  %v711_v41 = vmul.f32 %v703_v26, %v1702_v54 }
 0x231   :  { %v1330_v42 = vpop.eup %1329  ;;  %v621_v46 = vmul.f32 %v613_v32, %v1618_v1  ;;  %v754_v51 = vmul.f32 0.5, %v746_v33  ;;  %v606_v39 = vadd.f32 1.0, %v1328_v35  ;;  %v726_v56 = vadd.f32 %v718_v0, %v1685_v3 }
 0x232   :  { %v1332_v52 = vpop.eup %1331  ;;  %v747_v57 = vadd.f32 1.0, %v1330_v42  ;;  %1337 = vtanh.f32 %v593_v36  ;;  %v591_v45 = vmul.f32 0.7978846, %v583_v34  ;;  %v724_v55 = vadd.f32 %v716_v37, %v1694_v11 }
 0x233   :  { %v1334_v58 = vpop.eup %1333  ;;  %v762_v61 = vmul.f32 %v754_v51, %v1626_v6  ;;  %v614_v50 = vmul.f32 0.5, %v606_v39  ;;  %v734_v13 = vmul.f32 0.7978846, %v726_v56  ;;  %v594_v62 = vmul.f32 0.7978846, %v586_v38 }
 0x234   :  { %v1336_v63 = vpop.eup %1335  ;;  %v755_v2 = vmul.f32 0.5, %v747_v57  ;;  %1339 = vtanh.f32 %v591_v45  ;;  %v732_v1 = vmul.f32 0.7978846, %v724_v55  ;;  %v719_v44 = vmul.f32 0.044715, %v711_v41 }
 0x235   :  { %v622_v5 = vmul.f32 %v614_v50, %v1629_v8  ;;  %1341 = vtanh.f32 %v734_v13  ;;  %v576_v10 = vmul.f32 0.044715, %v568_v30  ;;  %v701_v14 = vmul.f32 %v1710_v24, %v1710_v24 }
 0x236   :  { %v763_v53 = vmul.f32 %v755_v2, %v1645_v18  ;;  %1343 = vtanh.f32 %v732_v1  ;;  %v727_v6 = vadd.f32 %v719_v44, %v1702_v54  ;;  %v603_v16 = vadd.f32 1.0, %v1326_v31 }
 0x237   :  { %v788_v17 = vpack.c.bf16 %v622_v5, %v621_v46  ;;  %1345 = vtanh.f32 %v594_v62  ;;  %v584_v19 = vadd.f32 %v576_v10, %v1690_v7  ;;  %v709_v20 = vmul.f32 %v701_v14, %v1710_v24 }
 0x238   :  { %v911_v47 = vpack.c.bf16 %v763_v53, %v762_v61  ;;  %v735_v22 = vmul.f32 0.7978846, %v727_v6  ;;  %v604_v8 = vadd.f32 1.0, %v1334_v58  ;;  %v611_v23 = vmul.f32 0.5, %v603_v16 }
 0x239   :  { %v592_v59 = vmul.f32 0.7978846, %v584_v19  ;;  %v717_v25 = vmul.f32 0.044715, %v709_v20  ;;  %v744_v48 = vadd.f32 1.0, %v1332_v52  ;;  %v745_v40 = vadd.f32 1.0, %v1336_v63 }
 0x23a   :  { %1347 = vtanh.f32 %v735_v22  ;;  %v612_v18 = vmul.f32 0.5, %v604_v8  ;;  %v619_v29 = vmul.f32 %v611_v23, %v1621_v4 }
 0x23b   :  { %1349 = vtanh.f32 %v592_v59  ;;  %v725_v26 = vadd.f32 %v717_v25, %v1710_v24  ;;  %v752_v27 = vmul.f32 0.5, %v744_v48  ;;  %v753_v28 = vmul.f32 0.5, %v745_v40 }
 0x23c   :  { %v1338_v60 = vpop.eup %1337  ;;  %v620_v30 = vmul.f32 %v612_v18, %v1637_v15 }
 0x23d   :  { %v733_v31 = vmul.f32 0.7978846, %v725_v26  ;;  %v760_v32 = vmul.f32 %v752_v27, %v1634_v12  ;;  %v761_v33 = vmul.f32 %v753_v28, %v1653_v21  ;;  %v609_v35 = vadd.f32 1.0, %v1338_v60 }
 0x23e   :  { %v1340_v0 = vpop.eup %1339  ;;  %v787_v34 = vpack.c.bf16 %v620_v30, %v619_v29 }
 0x23f   :  { %v1342_v36 = vpop.eup %1341  ;;  %1351 = vtanh.f32 %v733_v31  ;;  %v910_v37 = vpack.c.bf16 %v761_v33, %v760_v32  ;;  %v607_v42 = vadd.f32 1.0, %v1340_v0  ;;  %v617_v46 = vmul.f32 0.5, %v609_v35 }
 0x240   :  { %v1344_v38 = vpop.eup %1343  ;;  %1226 = vmatprep.mubr.bf16.mxu0 %v787_v34  ;;  %v750_v4 = vadd.f32 1.0, %v1342_v36 }
 0x241   :  { %v1346_v41 = vpop.eup %1345  ;;  %1250 = vmatprep.mubr.bf16.mxu1 %v910_v37  ;;  %1227 = vmatmul.mubr.bf16.vlgmr.msra.gmra.mrb[16].mxu0 %v788_v17  ;;  %v615_v21 = vmul.f32 0.5, %v607_v42  ;;  %v748_v45 = vadd.f32 1.0, %v1344_v38  ;;  %v625_v55 = vmul.f32 %v617_v46, %v1674_v49 }
 0x242   :  { %1251 = vmatmul.mubr.bf16.vlgmr.msra.gmra.mrb[16].mxu1 %v911_v47  ;;  %v610_v15 = vadd.f32 1.0, %v1346_v41  ;;  %v758_v52 = vmul.f32 0.5, %v750_v4 }
 0x243   :  { %v623_v1 = vmul.f32 %v615_v21, %v1677_v9  ;;  %v756_v10 = vmul.f32 0.5, %v748_v45  ;;  %v1033_v9 = vld [vmem:[%s1765_s2 + $0x2] ss:$0 sm:$0xff]  ;;  %s1431_s2 = smov [#allocation7]  }
 0x244   :  { %v1348_v51 = vpop.eup %1347  ;;  %v618_v12 = vmul.f32 0.5, %v610_v15  ;;  %v766_v63 = vmul.f32 %v758_v52, %v1685_v3  ;;  %s1000_s17 = sshll.u32 %s1431_s2, 4  ;;  %s1001_s17 = int_to_ptr.vmem [resolvable:$true] %s1000_s17 }
 0x245   :  { %v1350_v39 = vpop.eup %1349  ;;  %v751_v56 = vadd.f32 1.0, %v1348_v51  ;;  %v764_v49 = vmul.f32 %v756_v10, %v1694_v11  ;;  %s1397_s18 = scalar_lea.vmem %s1001_s17, 2048  ;;  %p1402_p3 = scmp.lt.s32.totalorder %s1001_s17, %s1001_s17 }
 0x246   :  { %v608_v57 = vadd.f32 1.0, %v1350_v39  ;;  %v626_v58 = vmul.f32 %v618_v12, %v1682_v43  ;;  %p1398_p2 = scmp.ne.s32.totalorder %s1001_s17, %s1397_s18  ;;  %p1403_p4 = scmp.lt.s32.totalorder %s1397_s18, %s1397_s18 }
 0x247   :  { %v759_v61 = vmul.f32 0.5, %v751_v56 }
 0x248   :  { %v616_v50 = vmul.f32 0.5, %v608_v57  ;;  %v790_v13 = vpack.c.bf16 %v626_v58, %v625_v55  ;;  %p1404_p5 = por %p1403_p4, %p1402_p3 }
 0x249   :  { %v1352_v62 = vpop.eup %1351  ;;  %v767_v2 = vmul.f32 %v759_v61, %v1702_v54 }
 0x24a   :  { %v624_v44 = vmul.f32 %v616_v50, %v1690_v7  ;;  %v749_v5 = vadd.f32 1.0, %v1352_v62  ;;  %p1405_p6 = pnand %p1404_p5, %p1398_p2 }
 0x24b   :  { %v913_v14 = vpack.c.bf16 %v767_v2, %v766_v63 }
 0x24c   :  { %v789_v53 = vpack.c.bf16 %v624_v44, %v623_v1  ;;  %v757_v6 = vmul.f32 0.5, %v749_v5 }
 0x24e   :  { %1230 = vmatprep.mubr.bf16.mxu0 %v789_v53  ;;  %v765_v43 = vmul.f32 %v757_v6, %v1710_v24 }
 0x24f   :  { %1231 = vmatmul.mubr.bf16.gmra.mrb[20].mxu0 %v790_v13 }
 0x250   :  { %v912_v16 = vpack.c.bf16 %v765_v43, %v764_v49 }
 0x252   :  { %1254 = vmatprep.mubr.bf16.mxu1 %v912_v16 }
 0x253   :  { %1255 = vmatmul.mubr.bf16.gmra.mrb[20].mxu1 %v913_v14 }
 0x314   :  { %v1228_v3 = vpop.f32.mrb[16].mxu0 }
 0x315   :  { %v888_v7 = vadd.f32 %v1228_v3, %v1033_v9  ;;  %v1252_v54 = vpop.f32.mrb[16].mxu1  ;;  %v879_v17 = vpop.f32.mrb[17].mxu0 }
 0x316   :  { %v957_v19 = vadd.f32 %v1252_v54, %v1033_v9  ;;  %v880_v20 = vadd.f32 %v1033_v9, %v879_v17  ;;  %v948_v47 = vpop.f32.mrb[17].mxu1  ;;  %v1229_v22 = vpop.f32.mrb[18].mxu0 }
 0x317   :  { %981 = vst [vmem:[#allocation7 + $0x10] sm:$0xff] %v888_v7  ;;  %v949_v11 = vadd.f32 %v1033_v9, %v948_v47  ;;  %v891_v8 = vadd.f32 %v1229_v22, %v1033_v9  ;;  %v1253_v24 = vpop.f32.mrb[18].mxu1  ;;  %v882_v23 = vpop.f32.mrb[19].mxu0 }
 0x318   :  { %989 = vst [vmem:[#allocation7 + $0x50] sm:$0xff] %v957_v19  ;;  %979 = vst [vmem:[#allocation7] sm:$0xff] %v880_v20  ;;  %v960_v59 = vadd.f32 %v1253_v24, %v1033_v9  ;;  %v883_v25 = vadd.f32 %v1033_v9, %v882_v23  ;;  %v951_v48 = vpop.f32.mrb[19].mxu1 }
 0x319   :  { %987 = vst [vmem:[#allocation7 + $0x40] sm:$0xff] %v949_v11  ;;  %982 = vst [vmem:[#allocation7 + $0x18] sm:$0xff] %v891_v8  ;;  %v952_v40 = vadd.f32 %v1033_v9, %v951_v48 }
 0x31a   :  { %990 = vst [vmem:[#allocation7 + $0x58] sm:$0xff] %v960_v59  ;;  %980 = vst [vmem:[#allocation7 + $0x8] sm:$0xff] %v883_v25 }
 0x31b   :  { %988 = vst [vmem:[#allocation7 + $0x48] sm:$0xff] %v952_v40 }
 0x322   :  { %v1232_v18 = vpop.f32.mrb[20].mxu0 }
 0x323   :  { %v904_v26 = vadd.f32 %v1232_v18, %v1033_v9  ;;  %v895_v27 = vpop.f32.mrb[21].mxu0 }
 0x324   :  { %v896_v28 = vadd.f32 %v1033_v9, %v895_v27  ;;  %v1233_v60 = vpop.f32.mrb[22].mxu0 }
 0x325   :  { %985 = vst [vmem:[#allocation7 + $0x30] sm:$0xff] %v904_v26  ;;  %v907_v29 = vadd.f32 %v1233_v60, %v1033_v9  ;;  %v898_v30 = vpop.f32.mrb[23].mxu0 }
 0x326   :  { %v1256_v31 = vpop.f32.mrb[20].mxu1  ;;  %983 = vst [vmem:[#allocation7 + $0x20] sm:$0xff] %v896_v28  ;;  %v899_v32 = vadd.f32 %v1033_v9, %v898_v30 }
 0x327   :  { %v973_v33 = vadd.f32 %v1256_v31, %v1033_v9  ;;  %v964_v0 = vpop.f32.mrb[21].mxu1  ;;  %986 = vst [vmem:[#allocation7 + $0x38] sm:$0xff] %v907_v29 }
 0x328   :  { %v965_v34 = vadd.f32 %v1033_v9, %v964_v0  ;;  %v1257_v35 = vpop.f32.mrb[22].mxu1  ;;  %984 = vst [vmem:[#allocation7 + $0x28] sm:$0xff] %v899_v32 }
 0x329   :  { %993 = vst [vmem:[#allocation7 + $0x70] sm:$0xff] %v973_v33  ;;  %v976_v36 = vadd.f32 %v1257_v35, %v1033_v9  ;;  %v967_v37 = vpop.f32.mrb[23].mxu1 }
 0x32a   :  { %991 = vst [vmem:[#allocation7 + $0x60] sm:$0xff] %v965_v34  ;;  %v968_v38 = vadd.f32 %v1033_v9, %v967_v37 }
 0x32b   :  { %994 = vst [vmem:[#allocation7 + $0x78] sm:$0xff] %v976_v36 }
 0x32c   :  { %992 = vst [vmem:[#allocation7 + $0x68] sm:$0xff] %v968_v38 }
 0x32d   :  { %1408 = shalt.err (!%p1405_p6)
}
 0x32e   :  { %s1409_s21 = scalar_lea.hbm %s1766_s3, 2048 }
 0x32f   :  { %p1410_p7 = scmp.ne.s32.totalorder %s1766_s3, %s1409_s21  ;;  %p1413_p8 = scmp.lt.u32.totalorder %s1409_s21, %s1766_s3 }
 0x331   :  { %p1415_p9 = pnand %p1413_p8, %p1410_p7 }
 0x333   :  { %1418 = shalt.err (!%p1415_p9)
}
 0x334   :  { %1006 = dma.vmem_to_hbm [thread:$0]  %s1001_s17, 2048, %s1766_s3, [#allocation4], %s1426_s22, %s1426_s22, %s1427_s23  }
 0x335   :  { %1423 = dma.done.wait [#allocation4], 2048  }
 0x336   :  { %1424 = vsyncadd [#allocation4], 4294965248 }
 0x337   :  { %1010 = vsyncpa [#allocation3], 1 }
 0x338   :  { %1011 = vsyncpa [#allocation6], 1 }
 0x339   :  { %1012 = vsyncpa [#allocation4], 1 }

// kernel: tpu_custom_call.1
= control target key start
LH: loop header
LB: loop body
LE: loop exit
PB: predicated region body
PF: predicated region fallthrough
CT: control target
= control target key end

     0   :  { %8 = vsyncpa [#allocation3], 0  ;;  %s1763_s0 = inlined_call_operand.hbm [shape: f32[128,128], index: 0, kind: input, shape index: {}]   ;;  %s1764_s1 = inlined_call_operand.hbm [shape: bf16[3,128,128], index: 1, kind: input, shape index: {}]   ;;  %s1765_s2 = inlined_call_operand.vmem [shape: f32[3,1,128], index: 2, kind: input, shape index: {}]   ;;  %s1766_s3 = inlined_call_operand.hbm [shape: f32[128,128], index: 3, kind: output, shape index: {}]  }
   0x1   :  { %9 = vsyncpa [#allocation6], 0 }
   0x2   :  { %10 = vsyncpa [#allocation4], 0  ;;  %s1425_s12 = smov [#allocation2]   ;;  %s1353_s16 = scalar_lea.hbm %s1763_s0, 2048 }
   0x3   :  { %s16_s13 = sshll.u32 %s1425_s12, 4  ;;  %p1354_p0 = scmp.ne.s32.totalorder %s1763_s0, %s1353_s16  ;;  %s17_s13 = int_to_ptr.vmem [resolvable:$true] %s16_s13 }
   0x4   :  { %p1357_p1 = scmp.lt.u32.totalorder %s1353_s16, %s1763_s0 }
   0x6   :  { %p1359_p2 = pnand %p1357_p1, %p1354_p0 }
   0x8   :  { %1362 = shalt.err (!%p1359_p2)
}
   0x9   :  { %s1363_s21 = scalar_lea.vmem %s17_s13, 2048  ;;  %p1368_p4 = scmp.lt.s32.totalorder %s17_s13, %s17_s13 }
   0xa   :  { %p1364_p3 = scmp.ne.s32.totalorder %s17_s13, %s1363_s21  ;;  %p1369_p5 = scmp.lt.s32.totalorder %s1363_s21, %s1363_s21 }
   0xc   :  { %p1370_p6 = por %p1369_p5, %p1368_p4 }
   0xe   :  { %p1371_p7 = pnand %p1370_p6, %p1364_p3 }
  0x10   :  { %1374 = shalt.err (!%p1371_p7)
}
  0x11   :  { %s1426_s22 = smov 128   ;;  %s1427_s23 = smov 8  }
  0x12   :  { %22 = dma.hbm_to_vmem [thread:$0]  %s1763_s0, 2048, %s17_s13, [#allocation3], %s1426_s22, %s1426_s22, %s1427_s23  }
  0x13   :  { %s1428_s26 = smov [#allocation5]   ;;  %s1375_s30 = scalar_lea.hbm %s1764_s1, 3072 }
  0x14   :  { %s28_s27 = sshll.u32 %s1428_s26, 4  ;;  %p1376_p8 = scmp.ne.s32.totalorder %s1764_s1, %s1375_s30  ;;  %s29_s27 = int_to_ptr.vmem [resolvable:$true] %s28_s27 }
  0x15   :  { %p1379_p9 = scmp.lt.u32.totalorder %s1375_s30, %s1764_s1 }
  0x17   :  { %p1381_p10 = pnand %p1379_p9, %p1376_p8 }
  0x19   :  { %1384 = shalt.err (!%p1381_p10)
}
  0x1a   :  { %s1385_s8 = scalar_lea.vmem %s29_s27, 3072  ;;  %p1390_p12 = scmp.lt.s32.totalorder %s29_s27, %s29_s27 }
  0x1b   :  { %p1386_p11 = scmp.ne.s32.totalorder %s29_s27, %s1385_s8  ;;  %p1391_p13 = scmp.lt.s32.totalorder %s1385_s8, %s1385_s8 }
  0x1d   :  { %p1392_p0 = por %p1391_p13, %p1390_p12 }
  0x1f   :  { %p1393_p1 = pnand %p1392_p0, %p1386_p11 }
  0x21   :  { %1396 = shalt.err (!%p1393_p1)
}
  0x22   :  { %s1429_s0 = smov 64   ;;  %s1430_s9 = smov 4  }
  0x23   :  { %34 = dma.hbm_to_vmem [thread:$0]  %s1764_s1, 3072, %s29_s27, [#allocation6], %s1429_s0, %s1429_s0, %s1430_s9  }
  0x24   :  { %1419 = dma.done.wait [#allocation3], 2048  }
  0x25   :  { %1420 = vsyncadd [#allocation3], 4294965248 }
  0x26   :  { %1421 = dma.done.wait [#allocation6], 3072  }
  0x27   :  { %1422 = vsyncadd [#allocation6], 4294964224  ;;  %v1265_v0 = vld [vmem:[#allocation5] sm:$0xff]   ;;  %v1266_v1 = vld [vmem:[#allocation5 + $0x8] sm:$0xff]  }
  0x28   :  { %1114 = vmatprep.subr.bf16.mxu0 %v1265_v0  ;;  %1138 = vmatprep.subr.bf16.mxu1 %v1265_v0  ;;  %v1267_v2 = vld [vmem:[#allocation5 + $0x10] sm:$0xff]   ;;  %v1268_v3 = vld [vmem:[#allocation5 + $0x18] sm:$0xff]   ;;  %v44_v4 = vld [vmem:[#allocation2] sm:$0xff] }
  0x29   :  { %1115 = vmatpush3.bf16.msra.mxu0 %v1265_v0  ;;  %1139 = vmatpush3.bf16.msra.mxu1 %v1265_v0  ;;  %v45_v5 = vld [vmem:[#allocation2 + $0x8] sm:$0xff]  ;;  %v52_v6 = vld [vmem:[#allocation2 + $0x40] sm:$0xff]  ;;  %v1271_v12 = vld [vmem:[#allocation5 + $0x30] sm:$0xff]  }
  0x2a   :  { %1116 = vmatprep.subr.bf16.mxu0 %v1266_v1  ;;  %1140 = vmatprep.subr.bf16.mxu1 %v1266_v1  ;;  %v77_v7 = vpack.c.bf16 %v45_v5, %v44_v4  ;;  %v53_v8 = vld [vmem:[#allocation2 + $0x48] sm:$0xff]  ;;  %v1269_v10 = vld [vmem:[#allocation5 + $0x20] sm:$0xff]   ;;  %v1272_v13 = vld [vmem:[#allocation5 + $0x38] sm:$0xff]  }
  0x2b   :  { %v272_v9 = vpack.c.bf16 %v53_v8, %v52_v6  ;;  %v1270_v11 = vld [vmem:[#allocation5 + $0x28] sm:$0xff]   ;;  %v46_v14 = vld [vmem:[#allocation2 + $0x10] sm:$0xff]  ;;  %v47_v15 = vld [vmem:[#allocation2 + $0x18] sm:$0xff] }
  0x2c   :  { %1130 = vmatprep.mubr.bf16.mxu0 %v77_v7  ;;  %v54_v16 = vld [vmem:[#allocation2 + $0x50] sm:$0xff]  ;;  %v55_v17 = vld [vmem:[#allocation2 + $0x58] sm:$0xff]  ;;  %v48_v18 = vld [vmem:[#allocation2 + $0x20] sm:$0xff]  ;;  %v78_v22 = vpack.c.bf16 %v47_v15, %v46_v14 }
  0x2d   :  { %1117 = vmatpush3.bf16.msra.mxu0 %v1266_v1  ;;  %1141 = vmatpush3.bf16.msra.mxu1 %v1266_v1  ;;  %v49_v19 = vld [vmem:[#allocation2 + $0x28] sm:$0xff]  ;;  %v56_v20 = vld [vmem:[#allocation2 + $0x60] sm:$0xff]  ;;  %v273_v23 = vpack.c.bf16 %v55_v17, %v54_v16  ;;  %v50_v26 = vld [vmem:[#allocation2 + $0x30] sm:$0xff] }
  0x2e   :  { %1118 = vmatprep.subr.bf16.mxu0 %v1267_v2  ;;  %1142 = vmatprep.subr.bf16.mxu1 %v1267_v2  ;;  %v57_v21 = vld [vmem:[#allocation2 + $0x68] sm:$0xff]  ;;  %v79_v24 = vpack.c.bf16 %v49_v19, %v48_v18  ;;  %v51_v27 = vld [vmem:[#allocation2 + $0x38] sm:$0xff]  ;;  %v58_v28 = vld [vmem:[#allocation2 + $0x70] sm:$0xff] }
  0x2f   :  { %1154 = vmatprep.mubr.bf16.mxu1 %v272_v9  ;;  %v274_v25 = vpack.c.bf16 %v57_v21, %v56_v20  ;;  %v59_v29 = vld [vmem:[#allocation2 + $0x78] sm:$0xff]  ;;  %v80_v30 = vpack.c.bf16 %v51_v27, %v50_v26  ;;  %v1273_v32 = vld [vmem:[#allocation5 + $0x40] sm:$0xff]   ;;  %v1274_v33 = vld [vmem:[#allocation5 + $0x48] sm:$0xff]  }
  0x30   :  { %v275_v31 = vpack.c.bf16 %v59_v29, %v58_v28  ;;  %v1275_v34 = vld [vmem:[#allocation5 + $0x50] sm:$0xff]   ;;  %v1276_v35 = vld [vmem:[#allocation5 + $0x58] sm:$0xff]   ;;  %v1277_v36 = vld [vmem:[#allocation5 + $0x60] sm:$0xff]  }
  0x31   :  { %1119 = vmatpush3.bf16.msra.mxu0 %v1267_v2  ;;  %1143 = vmatpush3.bf16.msra.mxu1 %v1267_v2  ;;  %v1278_v37 = vld [vmem:[#allocation5 + $0x68] sm:$0xff]   ;;  %v1279_v38 = vld [vmem:[#allocation5 + $0x70] sm:$0xff]   ;;  %v1280_v39 = vld [vmem:[#allocation5 + $0x78] sm:$0xff]  }
  0x32   :  { %1120 = vmatprep.subr.bf16.mxu0 %v1268_v3  ;;  %1144 = vmatprep.subr.bf16.mxu1 %v1268_v3  ;;  %v1482_v40 = vld [vmem:[%s1765_s2] ss:$0 sm:$0xff] }
  0x35   :  { %1121 = vmatpush3.bf16.msra.mxu0 %v1268_v3  ;;  %1145 = vmatpush3.bf16.msra.mxu1 %v1268_v3 }
  0x36   :  { %1122 = vmatprep.subr.bf16.mxu0 %v1269_v10  ;;  %1146 = vmatprep.subr.bf16.mxu1 %v1269_v10 }
  0x39   :  { %1123 = vmatpush3.bf16.msra.mxu0 %v1269_v10  ;;  %1147 = vmatpush3.bf16.msra.mxu1 %v1269_v10 }
  0x3a   :  { %1124 = vmatprep.subr.bf16.mxu0 %v1270_v11  ;;  %1148 = vmatprep.subr.bf16.mxu1 %v1270_v11 }
  0x3d   :  { %1125 = vmatpush3.bf16.msra.mxu0 %v1270_v11  ;;  %1149 = vmatpush3.bf16.msra.mxu1 %v1270_v11 }
  0x3e   :  { %1126 = vmatprep.subr.bf16.mxu0 %v1271_v12  ;;  %1150 = vmatprep.subr.bf16.mxu1 %v1271_v12 }
  0x41   :  { %1127 = vmatpush3.bf16.msra.mxu0 %v1271_v12  ;;  %1151 = vmatpush3.bf16.msra.mxu1 %v1271_v12 }
  0x42   :  { %1128 = vmatprep.subr.bf16.mxu0 %v1272_v13  ;;  %1152 = vmatprep.subr.bf16.mxu1 %v1272_v13 }
  0x45   :  { %1129 = vmatpush3.bf16.msra.mxu0 %v1272_v13  ;;  %1153 = vmatpush3.bf16.msra.mxu1 %v1272_v13 }
  0x46   :  { %1162 = vmatprep.subr.bf16.mxu0 %v1273_v32  ;;  %1186 = vmatprep.subr.bf16.mxu1 %v1273_v32 }
  0x48   :  { %1131 = vmatmul.mubr.bf16.vlgmr.msra.gmra.mrb[0].mxu0 %v78_v22  ;;  %1155 = vmatmul.mubr.bf16.vlgmr.msra.gmra.mrb[0].mxu1 %v273_v23 }
  0x49   :  { %1134 = vmatprep.mubr.bf16.mxu0 %v79_v24  ;;  %1158 = vmatprep.mubr.bf16.mxu1 %v274_v25 }
  0x4a   :  { %1163 = vmatpush3.bf16.msra.mxu0 %v1273_v32  ;;  %1187 = vmatpush3.bf16.msra.mxu1 %v1273_v32 }
  0x4b   :  { %1164 = vmatprep.subr.bf16.mxu0 %v1274_v33  ;;  %1188 = vmatprep.subr.bf16.mxu1 %v1274_v33 }
  0x4e   :  { %1165 = vmatpush3.bf16.msra.mxu0 %v1274_v33  ;;  %1189 = vmatpush3.bf16.msra.mxu1 %v1274_v33 }
  0x4f   :  { %1166 = vmatprep.subr.bf16.mxu0 %v1275_v34  ;;  %1190 = vmatprep.subr.bf16.mxu1 %v1275_v34 }
  0x50   :  { %1135 = vmatmul.mubr.bf16.gmra.mrb[4].mxu0 %v80_v30  ;;  %1159 = vmatmul.mubr.bf16.gmra.mrb[4].mxu1 %v275_v31 }
  0x52   :  { %1167 = vmatpush3.bf16.msra.mxu0 %v1275_v34  ;;  %1191 = vmatpush3.bf16.msra.mxu1 %v1275_v34 }
  0x53   :  { %1168 = vmatprep.subr.bf16.mxu0 %v1276_v35  ;;  %1192 = vmatprep.subr.bf16.mxu1 %v1276_v35 }
  0x56   :  { %1169 = vmatpush3.bf16.msra.mxu0 %v1276_v35  ;;  %1193 = vmatpush3.bf16.msra.mxu1 %v1276_v35 }
  0x57   :  { %1170 = vmatprep.subr.bf16.mxu0 %v1277_v36  ;;  %1194 = vmatprep.subr.bf16.mxu1 %v1277_v36 }
  0x5a   :  { %1171 = vmatpush3.bf16.msra.mxu0 %v1277_v36  ;;  %1195 = vmatpush3.bf16.msra.mxu1 %v1277_v36 }
  0x5b   :  { %1172 = vmatprep.subr.bf16.mxu0 %v1278_v37  ;;  %1196 = vmatprep.subr.bf16.mxu1 %v1278_v37 }
  0x5e   :  { %1173 = vmatpush3.bf16.msra.mxu0 %v1278_v37  ;;  %1197 = vmatpush3.bf16.msra.mxu1 %v1278_v37 }
  0x5f   :  { %1174 = vmatprep.subr.bf16.mxu0 %v1279_v38  ;;  %1198 = vmatprep.subr.bf16.mxu1 %v1279_v38 }
  0x62   :  { %1175 = vmatpush3.bf16.msra.mxu0 %v1279_v38  ;;  %1199 = vmatpush3.bf16.msra.mxu1 %v1279_v38 }
  0x63   :  { %1176 = vmatprep.subr.bf16.mxu0 %v1280_v39  ;;  %1200 = vmatprep.subr.bf16.mxu1 %v1280_v39 }
  0x66   :  { %1177 = vmatpush3.bf16.msra.mxu0 %v1280_v39  ;;  %1201 = vmatpush3.bf16.msra.mxu1 %v1280_v39 }
 0x11b   :  { %v1132_v41 = vpop.f32.mrb[0].mxu0  ;;  %v1156_v42 = vpop.f32.mrb[0].mxu1 }
 0x11c   :  { %v1485_v43 = vadd.f32 %v1132_v41, %v1482_v40  ;;  %v1488_v44 = vadd.f32 %v1156_v42, %v1482_v40  ;;  %v169_v45 = vpop.f32.mrb[1].mxu0  ;;  %v310_v46 = vpop.f32.mrb[1].mxu1 }
 0x11d   :  { %v1491_v47 = vadd.f32 %v1482_v40, %v169_v45  ;;  %v1494_v48 = vadd.f32 %v1482_v40, %v310_v46  ;;  %v1133_v49 = vpop.f32.mrb[2].mxu0  ;;  %v1157_v50 = vpop.f32.mrb[2].mxu1 }
 0x11e   :  { %v202_v51 = vmul.f32 %v1485_v43, %v1485_v43  ;;  %v343_v52 = vmul.f32 %v1488_v44, %v1488_v44  ;;  %v1501_v53 = vadd.f32 %v1133_v49, %v1482_v40  ;;  %v1504_v54 = vadd.f32 %v1157_v50, %v1482_v40  ;;  %v172_v55 = vpop.f32.mrb[3].mxu0  ;;  %v313_v56 = vpop.f32.mrb[3].mxu1 }
 0x11f   :  { %v200_v57 = vmul.f32 %v1491_v47, %v1491_v47  ;;  %v341_v58 = vmul.f32 %v1494_v48, %v1494_v48  ;;  %v1511_v59 = vadd.f32 %v1482_v40, %v172_v55  ;;  %v1514_v60 = vadd.f32 %v1482_v40, %v313_v56 }
 0x120   :  { %v210_v61 = vmul.f32 %v202_v51, %v1485_v43  ;;  %v351_v62 = vmul.f32 %v343_v52, %v1488_v44  ;;  %v203_v63 = vmul.f32 %v1501_v53, %v1501_v53  ;;  %v344_v0 = vmul.f32 %v1504_v54, %v1504_v54 }
 0x121   :  { %v208_v1 = vmul.f32 %v200_v57, %v1491_v47  ;;  %v349_v2 = vmul.f32 %v341_v58, %v1494_v48  ;;  %v201_v3 = vmul.f32 %v1511_v59, %v1511_v59  ;;  %v342_v4 = vmul.f32 %v1514_v60, %v1514_v60 }
 0x122   :  { %v218_v5 = vmul.f32 0.044715, %v210_v61  ;;  %v359_v6 = vmul.f32 0.044715, %v351_v62  ;;  %v211_v7 = vmul.f32 %v203_v63, %v1501_v53  ;;  %v352_v8 = vmul.f32 %v344_v0, %v1504_v54 }
 0x123   :  { %v216_v9 = vmul.f32 0.044715, %v208_v1  ;;  %v357_v10 = vmul.f32 0.044715, %v349_v2  ;;  %v209_v11 = vmul.f32 %v201_v3, %v1511_v59  ;;  %v350_v12 = vmul.f32 %v342_v4, %v1514_v60  ;;  %v1136_v13 = vpop.f32.mrb[4].mxu0  ;;  %v1160_v14 = vpop.f32.mrb[4].mxu1 }
 0x124   :  { %v226_v15 = vadd.f32 %v218_v5, %v1485_v43  ;;  %v367_v16 = vadd.f32 %v359_v6, %v1488_v44  ;;  %v219_v17 = vmul.f32 0.044715, %v211_v7  ;;  %v360_v18 = vmul.f32 0.044715, %v352_v8  ;;  %v185_v19 = vpop.f32.mrb[5].mxu0  ;;  %v326_v20 = vpop.f32.mrb[5].mxu1 }
 0x125   :  { %v224_v21 = vadd.f32 %v216_v9, %v1491_v47  ;;  %v365_v22 = vadd.f32 %v357_v10, %v1494_v48  ;;  %v217_v23 = vmul.f32 0.044715, %v209_v11  ;;  %v358_v24 = vmul.f32 0.044715, %v350_v12  ;;  %v1137_v25 = vpop.f32.mrb[6].mxu0  ;;  %v1161_v26 = vpop.f32.mrb[6].mxu1 }
 0x126   :  { %v234_v27 = vmul.f32 0.7978846, %v226_v15  ;;  %v375_v28 = vmul.f32 0.7978846, %v367_v16  ;;  %v227_v29 = vadd.f32 %v219_v17, %v1501_v53  ;;  %v368_v30 = vadd.f32 %v360_v18, %v1504_v54  ;;  %v188_v31 = vpop.f32.mrb[7].mxu0  ;;  %v329_v32 = vpop.f32.mrb[7].mxu1 }
 0x127   :  { %v232_v33 = vmul.f32 0.7978846, %v224_v21  ;;  %v373_v34 = vmul.f32 0.7978846, %v365_v22  ;;  %v225_v35 = vadd.f32 %v217_v23, %v1511_v59  ;;  %v366_v36 = vadd.f32 %v358_v24, %v1514_v60 }
 0x128   :  { %1289 = vtanh.f32 %v234_v27  ;;  %v235_v37 = vmul.f32 0.7978846, %v227_v29  ;;  %v376_v38 = vmul.f32 0.7978846, %v368_v30  ;;  %v1541_v39 = vadd.f32 %v1136_v13, %v1482_v40 }
 0x129   :  { %1291 = vtanh.f32 %v375_v28  ;;  %v233_v41 = vmul.f32 0.7978846, %v225_v35  ;;  %v374_v42 = vmul.f32 0.7978846, %v366_v36  ;;  %v1544_v45 = vadd.f32 %v1160_v14, %v1482_v40 }
 0x12a   :  { %1293 = vtanh.f32 %v232_v33  ;;  %v206_v46 = vmul.f32 %v1541_v39, %v1541_v39  ;;  %v1549_v49 = vadd.f32 %v1482_v40, %v185_v19  ;;  %v1552_v50 = vadd.f32 %v1482_v40, %v326_v20 }
 0x12b   :  { %1295 = vtanh.f32 %v373_v34  ;;  %v347_v51 = vmul.f32 %v1544_v45, %v1544_v45  ;;  %v1557_v52 = vadd.f32 %v1137_v25, %v1482_v40  ;;  %v1560_v55 = vadd.f32 %v1161_v26, %v1482_v40 }
 0x12c   :  { %1297 = vtanh.f32 %v235_v37  ;;  %v214_v56 = vmul.f32 %v206_v46, %v1541_v39  ;;  %v204_v57 = vmul.f32 %v1549_v49, %v1549_v49  ;;  %v345_v58 = vmul.f32 %v1552_v50, %v1552_v50 }
 0x12d   :  { %1299 = vtanh.f32 %v376_v38  ;;  %v355_v61 = vmul.f32 %v347_v51, %v1544_v45  ;;  %v207_v62 = vmul.f32 %v1557_v52, %v1557_v52  ;;  %v348_v63 = vmul.f32 %v1560_v55, %v1560_v55 }
 0x12e   :  { %1301 = vtanh.f32 %v233_v41  ;;  %v222_v0 = vmul.f32 0.044715, %v214_v56  ;;  %v212_v1 = vmul.f32 %v204_v57, %v1549_v49  ;;  %v353_v2 = vmul.f32 %v345_v58, %v1552_v50 }
 0x12f   :  { %1303 = vtanh.f32 %v374_v42  ;;  %v363_v3 = vmul.f32 0.044715, %v355_v61  ;;  %v215_v4 = vmul.f32 %v207_v62, %v1557_v52  ;;  %v356_v5 = vmul.f32 %v348_v63, %v1560_v55 }
 0x130   :  { %v230_v6 = vadd.f32 %v222_v0, %v1541_v39  ;;  %v220_v7 = vmul.f32 0.044715, %v212_v1  ;;  %v361_v8 = vmul.f32 0.044715, %v353_v2  ;;  %v1578_v9 = vadd.f32 %v1482_v40, %v188_v31 }
 0x131   :  { %v371_v10 = vadd.f32 %v363_v3, %v1544_v45  ;;  %v223_v11 = vmul.f32 0.044715, %v215_v4  ;;  %v364_v12 = vmul.f32 0.044715, %v356_v5  ;;  %v1582_v13 = vadd.f32 %v1482_v40, %v329_v32 }
 0x132   :  { %v1290_v14 = vpop.eup %1289  ;;  %v238_v15 = vmul.f32 0.7978846, %v230_v6  ;;  %v228_v16 = vadd.f32 %v220_v7, %v1549_v49  ;;  %v369_v17 = vadd.f32 %v361_v8, %v1552_v50  ;;  %v205_v18 = vmul.f32 %v1578_v9, %v1578_v9 }
 0x133   :  { %v1292_v19 = vpop.eup %1291  ;;  %v250_v20 = vadd.f32 1.0, %v1290_v14  ;;  %v379_v21 = vmul.f32 0.7978846, %v371_v10  ;;  %v231_v22 = vadd.f32 %v223_v11, %v1557_v52  ;;  %v372_v23 = vadd.f32 %v364_v12, %v1560_v55 }
 0x134   :  { %v1294_v24 = vpop.eup %1293  ;;  %v391_v25 = vadd.f32 1.0, %v1292_v19  ;;  %1305 = vtanh.f32 %v238_v15  ;;  %v236_v40 = vmul.f32 0.7978846, %v228_v16  ;;  %v377_v26 = vmul.f32 0.7978846, %v369_v17 }
 0x135   :  { %v1296_v27 = vpop.eup %1295  ;;  %v258_v28 = vmul.f32 0.5, %v250_v20  ;;  %1307 = vtanh.f32 %v379_v21  ;;  %v239_v29 = vmul.f32 0.7978846, %v231_v22  ;;  %v380_v30 = vmul.f32 0.7978846, %v372_v23 }
 0x136   :  { %v1298_v31 = vpop.eup %1297  ;;  %v399_v32 = vmul.f32 0.5, %v391_v25  ;;  %1309 = vtanh.f32 %v236_v40  ;;  %v213_v33 = vmul.f32 %v205_v18, %v1578_v9  ;;  %v346_v34 = vmul.f32 %v1582_v13, %v1582_v13 }
 0x137   :  { %v1300_v35 = vpop.eup %1299  ;;  %v266_v36 = vmul.f32 %v258_v28, %v1485_v43  ;;  %v251_v37 = vadd.f32 1.0, %v1298_v31  ;;  %1311 = vtanh.f32 %v377_v26  ;;  %v248_v38 = vadd.f32 1.0, %v1294_v24 }
 0x138   :  { %v1302_v41 = vpop.eup %1301  ;;  %v407_v42 = vmul.f32 %v399_v32, %v1488_v44  ;;  %v392_v46 = vadd.f32 1.0, %v1300_v35  ;;  %1313 = vtanh.f32 %v239_v29  ;;  %v221_v51 = vmul.f32 0.044715, %v213_v33 }
 0x139   :  { %v1304_v56 = vpop.eup %1303  ;;  %v259_v57 = vmul.f32 0.5, %v251_v37  ;;  %1315 = vtanh.f32 %v380_v30  ;;  %v354_v58 = vmul.f32 %v346_v34, %v1582_v13  ;;  %v249_v61 = vadd.f32 1.0, %v1302_v41 }
 0x13a   :  { %v400_v62 = vmul.f32 0.5, %v392_v46  ;;  %v229_v63 = vadd.f32 %v221_v51, %v1578_v9  ;;  %v256_v0 = vmul.f32 0.5, %v248_v38  ;;  %v389_v43 = vadd.f32 1.0, %v1296_v27 }
 0x13b   :  { %v267_v1 = vmul.f32 %v259_v57, %v1501_v53  ;;  %v362_v2 = vmul.f32 0.044715, %v354_v58  ;;  %v257_v3 = vmul.f32 0.5, %v249_v61  ;;  %v390_v4 = vadd.f32 1.0, %v1304_v56  ;;  %v1281_v58 = vld [vmem:[#allocation5 + $0x80] sm:$0xff]   ;;  %v1282_v61 = vld [vmem:[#allocation5 + $0x88] sm:$0xff]  }
 0x13c   :  { %v408_v44 = vmul.f32 %v400_v62, %v1504_v54  ;;  %v237_v5 = vmul.f32 0.7978846, %v229_v63  ;;  %v264_v6 = vmul.f32 %v256_v0, %v1491_v47  ;;  %v397_v7 = vmul.f32 0.5, %v389_v43  ;;  %1210 = vmatprep.subr.bf16.mxu0 %v1281_v58  ;;  %1234 = vmatprep.subr.bf16.mxu1 %v1281_v58  ;;  %v1287_v62 = vld [vmem:[#allocation5 + $0xb0] sm:$0xff]   ;;  %v1288_v63 = vld [vmem:[#allocation5 + $0xb8] sm:$0xff]  }
 0x13d   :  { %v433_v8 = vpack.c.bf16 %v267_v1, %v266_v36  ;;  %v370_v10 = vadd.f32 %v362_v2, %v1582_v13  ;;  %v265_v11 = vmul.f32 %v257_v3, %v1511_v59  ;;  %v398_v12 = vmul.f32 0.5, %v390_v4  ;;  %v1615_v0 = vld [vmem:[%s1765_s2 + $0x1] ss:$0 sm:$0xff] }
 0x13e   :  { %v1306_v14 = vpop.eup %1305  ;;  %v628_v15 = vpack.c.bf16 %v408_v44, %v407_v42  ;;  %1317 = vtanh.f32 %v237_v5  ;;  %v405_v53 = vmul.f32 %v397_v7, %v1494_v48 }
 0x13f   :  { %v1308_v16 = vpop.eup %1307  ;;  %v378_v17 = vmul.f32 0.7978846, %v370_v10  ;;  %v432_v18 = vpack.c.bf16 %v265_v11, %v264_v6  ;;  %v406_v54 = vmul.f32 %v398_v12, %v1514_v60  ;;  %v254_v19 = vadd.f32 1.0, %v1306_v14 }
 0x140   :  { %v1310_v20 = vpop.eup %1309  ;;  %v395_v47 = vadd.f32 1.0, %v1308_v16 }
 0x141   :  { %v1312_v21 = vpop.eup %1311  ;;  %1319 = vtanh.f32 %v378_v17  ;;  %1178 = vmatprep.mubr.bf16.mxu0 %v432_v18  ;;  %v627_v22 = vpack.c.bf16 %v406_v54, %v405_v53  ;;  %v262_v25 = vmul.f32 0.5, %v254_v19  ;;  %v252_v26 = vadd.f32 1.0, %v1310_v20 }
 0x142   :  { %v1314_v23 = vpop.eup %1313  ;;  %1179 = vmatmul.mubr.bf16.vlgmr.msra.gmra.mrb[8].mxu0 %v433_v8  ;;  %v403_v40 = vmul.f32 0.5, %v395_v47  ;;  %v393_v31 = vadd.f32 1.0, %v1312_v21 }
 0x143   :  { %v1316_v59 = vpop.eup %1315  ;;  %1202 = vmatprep.mubr.bf16.mxu1 %v627_v22  ;;  %v255_v24 = vadd.f32 1.0, %v1314_v23  ;;  %v270_v60 = vmul.f32 %v262_v25, %v1541_v39  ;;  %v260_v35 = vmul.f32 0.5, %v252_v26  ;;  %1211 = vmatpush3.bf16.msra.mxu0 %v1281_v58 }
 0x144   :  { %1203 = vmatmul.mubr.bf16.vlgmr.msra.gmra.mrb[8].mxu1 %v628_v15  ;;  %v396_v48 = vadd.f32 1.0, %v1316_v59  ;;  %v411_v32 = vmul.f32 %v403_v40, %v1544_v45  ;;  %v401_v46 = vmul.f32 0.5, %v393_v31  ;;  %1212 = vmatprep.subr.bf16.mxu0 %v1282_v61 }
 0x145   :  { %v263_v27 = vmul.f32 0.5, %v255_v24  ;;  %v268_v51 = vmul.f32 %v260_v35, %v1549_v49  ;;  %1235 = vmatpush3.bf16.msra.mxu1 %v1281_v58  ;;  %v1283_v49 = vld [vmem:[#allocation5 + $0x90] sm:$0xff]  }
 0x146   :  { %v404_v28 = vmul.f32 0.5, %v396_v48  ;;  %v409_v57 = vmul.f32 %v401_v46, %v1552_v50  ;;  %1236 = vmatprep.subr.bf16.mxu1 %v1282_v61  ;;  %v1284_v50 = vld [vmem:[#allocation5 + $0x98] sm:$0xff]  }
 0x147   :  { %v271_v29 = vmul.f32 %v263_v27, %v1557_v52  ;;  %1213 = vmatpush3.bf16.msra.mxu0 %v1282_v61 }
 0x148   :  { %v1318_v30 = vpop.eup %1317  ;;  %v412_v33 = vmul.f32 %v404_v28, %v1560_v55  ;;  %1214 = vmatprep.subr.bf16.mxu0 %v1283_v49 }
 0x149   :  { %v253_v34 = vadd.f32 1.0, %v1318_v30  ;;  %v435_v36 = vpack.c.bf16 %v271_v29, %v270_v60  ;;  %1237 = vmatpush3.bf16.msra.mxu1 %v1282_v61 }
 0x14a   :  { %v630_v37 = vpack.c.bf16 %v412_v33, %v411_v32  ;;  %1238 = vmatprep.subr.bf16.mxu1 %v1283_v49 }
 0x14b   :  { %v1320_v38 = vpop.eup %1319  ;;  %v261_v41 = vmul.f32 0.5, %v253_v34  ;;  %1215 = vmatpush3.bf16.msra.mxu0 %v1283_v49 }
 0x14c   :  { %v394_v42 = vadd.f32 1.0, %v1320_v38  ;;  %1216 = vmatprep.subr.bf16.mxu0 %v1284_v50 }
 0x14d   :  { %v269_v39 = vmul.f32 %v261_v41, %v1578_v9  ;;  %1239 = vmatpush3.bf16.msra.mxu1 %v1283_v49  ;;  %v1285_v9 = vld [vmem:[#allocation5 + $0xa0] sm:$0xff]  }
 0x14e   :  { %v402_v56 = vmul.f32 0.5, %v394_v42  ;;  %1240 = vmatprep.subr.bf16.mxu1 %v1284_v50 }
 0x14f   :  { %v434_v52 = vpack.c.bf16 %v269_v39, %v268_v51  ;;  %1217 = vmatpush3.bf16.msra.mxu0 %v1284_v50 }
 0x150   :  { %v410_v45 = vmul.f32 %v402_v56, %v1582_v13  ;;  %1218 = vmatprep.subr.bf16.mxu0 %v1285_v9  ;;  %v1286_v13 = vld [vmem:[#allocation5 + $0xa8] sm:$0xff]  }
 0x151   :  { %1182 = vmatprep.mubr.bf16.mxu0 %v434_v52  ;;  %1241 = vmatpush3.bf16.msra.mxu1 %v1284_v50 }
 0x152   :  { %v629_v55 = vpack.c.bf16 %v410_v45, %v409_v57  ;;  %1183 = vmatmul.mubr.bf16.gmra.mrb[12].mxu0 %v435_v36  ;;  %1242 = vmatprep.subr.bf16.mxu1 %v1285_v9 }
 0x153   :  { %1219 = vmatpush3.bf16.msra.mxu0 %v1285_v9 }
 0x154   :  { %1206 = vmatprep.mubr.bf16.mxu1 %v629_v55  ;;  %1220 = vmatprep.subr.bf16.mxu0 %v1286_v13 }
 0x155   :  { %1207 = vmatmul.mubr.bf16.gmra.mrb[12].mxu1 %v630_v37 }
 0x156   :  { %1243 = vmatpush3.bf16.msra.mxu1 %v1285_v9 }
 0x157   :  { %1244 = vmatprep.subr.bf16.mxu1 %v1286_v13  ;;  %1221 = vmatpush3.bf16.msra.mxu0 %v1286_v13 }
 0x158   :  { %1222 = vmatprep.subr.bf16.mxu0 %v1287_v62 }
 0x15a   :  { %1245 = vmatpush3.bf16.msra.mxu1 %v1286_v13 }
 0x15b   :  { %1246 = vmatprep.subr.bf16.mxu1 %v1287_v62  ;;  %1223 = vmatpush3.bf16.msra.mxu0 %v1287_v62 }
 0x15c   :  { %1224 = vmatprep.subr.bf16.mxu0 %v1288_v63 }
 0x15e   :  { %1247 = vmatpush3.bf16.msra.mxu1 %v1287_v62 }
 0x15f   :  { %1248 = vmatprep.subr.bf16.mxu1 %v1288_v63  ;;  %1225 = vmatpush3.bf16.msra.mxu0 %v1288_v63 }
 0x162   :  { %1249 = vmatpush3.bf16.msra.mxu1 %v1288_v63 }
 0x215   :  { %v1180_v43 = vpop.f32.mrb[8].mxu0 }
 0x216   :  { %v1618_v1 = vadd.f32 %v1180_v43, %v1615_v0  ;;  %v524_v2 = vpop.f32.mrb[9].mxu0 }
 0x217   :  { %v1204_v3 = vpop.f32.mrb[8].mxu1  ;;  %v1621_v4 = vadd.f32 %v1615_v0, %v524_v2  ;;  %v1181_v44 = vpop.f32.mrb[10].mxu0 }
 0x218   :  { %v557_v5 = vmul.f32 %v1618_v1, %v1618_v1  ;;  %v1626_v6 = vadd.f32 %v1204_v3, %v1615_v0  ;;  %v665_v7 = vpop.f32.mrb[9].mxu1  ;;  %v1629_v8 = vadd.f32 %v1181_v44, %v1615_v0  ;;  %v527_v10 = vpop.f32.mrb[11].mxu0 }
 0x219   :  { %v555_v11 = vmul.f32 %v1621_v4, %v1621_v4  ;;  %v1634_v12 = vadd.f32 %v1615_v0, %v665_v7  ;;  %v1205_v14 = vpop.f32.mrb[10].mxu1  ;;  %v1637_v15 = vadd.f32 %v1615_v0, %v527_v10 }
 0x21a   :  { %v565_v53 = vmul.f32 %v557_v5, %v1618_v1  ;;  %v698_v16 = vmul.f32 %v1626_v6, %v1626_v6  ;;  %v558_v17 = vmul.f32 %v1629_v8, %v1629_v8  ;;  %v1645_v18 = vadd.f32 %v1205_v14, %v1615_v0  ;;  %v668_v54 = vpop.f32.mrb[11].mxu1 }
 0x21b   :  { %v563_v19 = vmul.f32 %v555_v11, %v1621_v4  ;;  %v696_v20 = vmul.f32 %v1634_v12, %v1634_v12  ;;  %v556_v47 = vmul.f32 %v1637_v15, %v1637_v15  ;;  %v1653_v21 = vadd.f32 %v1615_v0, %v668_v54 }
 0x21c   :  { %v573_v22 = vmul.f32 0.044715, %v565_v53  ;;  %v706_v23 = vmul.f32 %v698_v16, %v1626_v6  ;;  %v566_v59 = vmul.f32 %v558_v17, %v1629_v8  ;;  %v699_v24 = vmul.f32 %v1645_v18, %v1645_v18 }
 0x21d   :  { %v571_v25 = vmul.f32 0.044715, %v563_v19  ;;  %v704_v48 = vmul.f32 %v696_v20, %v1634_v12  ;;  %v564_v40 = vmul.f32 %v556_v47, %v1637_v15  ;;  %v697_v26 = vmul.f32 %v1653_v21, %v1653_v21 }
 0x21e   :  { %v581_v27 = vadd.f32 %v573_v22, %v1618_v1  ;;  %v714_v28 = vmul.f32 0.044715, %v706_v23  ;;  %v574_v60 = vmul.f32 0.044715, %v566_v59  ;;  %v707_v29 = vmul.f32 %v699_v24, %v1645_v18 }
 0x21f   :  { %v579_v30 = vadd.f32 %v571_v25, %v1621_v4  ;;  %v712_v31 = vmul.f32 0.044715, %v704_v48  ;;  %v572_v32 = vmul.f32 0.044715, %v564_v40  ;;  %v705_v33 = vmul.f32 %v697_v26, %v1653_v21 }
 0x220   :  { %v589_v34 = vmul.f32 0.7978846, %v581_v27  ;;  %v722_v35 = vadd.f32 %v714_v28, %v1626_v6  ;;  %v582_v36 = vadd.f32 %v574_v60, %v1629_v8  ;;  %v715_v37 = vmul.f32 0.044715, %v707_v29 }
 0x221   :  { %v587_v38 = vmul.f32 0.7978846, %v579_v30  ;;  %v720_v41 = vadd.f32 %v712_v31, %v1634_v12  ;;  %v580_v42 = vadd.f32 %v572_v32, %v1637_v15  ;;  %v713_v46 = vmul.f32 0.044715, %v705_v33 }
 0x222   :  { %1321 = vtanh.f32 %v589_v34  ;;  %v730_v51 = vmul.f32 0.7978846, %v722_v35  ;;  %v590_v39 = vmul.f32 0.7978846, %v582_v36  ;;  %v723_v56 = vadd.f32 %v715_v37, %v1645_v18 }
 0x223   :  { %v721_v52 = vadd.f32 %v713_v46, %v1653_v21  ;;  %v728_v57 = vmul.f32 0.7978846, %v720_v41  ;;  %v588_v55 = vmul.f32 0.7978846, %v580_v42 }
 0x224   :  { %1323 = vtanh.f32 %v730_v51  ;;  %v731_v45 = vmul.f32 0.7978846, %v723_v56 }
 0x225   :  { %1325 = vtanh.f32 %v587_v38  ;;  %v1184_v58 = vpop.f32.mrb[12].mxu0  ;;  %v729_v61 = vmul.f32 0.7978846, %v721_v52 }
 0x226   :  { %1327 = vtanh.f32 %v590_v39  ;;  %v1674_v49 = vadd.f32 %v1184_v58, %v1615_v0  ;;  %v540_v50 = vpop.f32.mrb[13].mxu0 }
 0x227   :  { %1329 = vtanh.f32 %v731_v45  ;;  %v1677_v9 = vadd.f32 %v1615_v0, %v540_v50  ;;  %v1185_v13 = vpop.f32.mrb[14].mxu0 }
 0x228   :  { %1331 = vtanh.f32 %v728_v57  ;;  %v561_v62 = vmul.f32 %v1674_v49, %v1674_v49  ;;  %v1208_v63 = vpop.f32.mrb[12].mxu1  ;;  %v1682_v43 = vadd.f32 %v1185_v13, %v1615_v0  ;;  %v543_v2 = vpop.f32.mrb[15].mxu0 }
 0x229   :  { %1333 = vtanh.f32 %v588_v55  ;;  %v1685_v3 = vadd.f32 %v1208_v63, %v1615_v0  ;;  %v559_v44 = vmul.f32 %v1677_v9, %v1677_v9  ;;  %v681_v5 = vpop.f32.mrb[13].mxu1  ;;  %v1690_v7 = vadd.f32 %v1615_v0, %v543_v2 }
 0x22a   :  { %1335 = vtanh.f32 %v729_v61  ;;  %v569_v10 = vmul.f32 %v561_v62, %v1674_v49  ;;  %v1694_v11 = vadd.f32 %v1615_v0, %v681_v5  ;;  %v562_v14 = vmul.f32 %v1682_v43, %v1682_v43  ;;  %v1209_v53 = vpop.f32.mrb[14].mxu1 }
 0x22b   :  { %v702_v16 = vmul.f32 %v1685_v3, %v1685_v3  ;;  %v567_v17 = vmul.f32 %v559_v44, %v1677_v9  ;;  %v1702_v54 = vadd.f32 %v1209_v53, %v1615_v0  ;;  %v560_v19 = vmul.f32 %v1690_v7, %v1690_v7  ;;  %v684_v20 = vpop.f32.mrb[15].mxu1 }
 0x22c   :  { %v1322_v47 = vpop.eup %1321  ;;  %v577_v22 = vmul.f32 0.044715, %v569_v10  ;;  %v700_v23 = vmul.f32 %v1694_v11, %v1694_v11  ;;  %v570_v59 = vmul.f32 %v562_v14, %v1682_v43  ;;  %v1710_v24 = vadd.f32 %v1615_v0, %v684_v20 }
 0x22d   :  { %v605_v25 = vadd.f32 1.0, %v1322_v47  ;;  %v710_v48 = vmul.f32 %v702_v16, %v1685_v3  ;;  %v575_v40 = vmul.f32 0.044715, %v567_v17  ;;  %v703_v26 = vmul.f32 %v1702_v54, %v1702_v54 }
 0x22e   :  { %v1324_v27 = vpop.eup %1323  ;;  %v585_v28 = vadd.f32 %v577_v22, %v1674_v49  ;;  %v708_v60 = vmul.f32 %v700_v23, %v1694_v11  ;;  %v578_v29 = vmul.f32 0.044715, %v570_v59  ;;  %v568_v30 = vmul.f32 %v560_v19, %v1690_v7 }
 0x22f   :  { %v1326_v31 = vpop.eup %1325  ;;  %v613_v32 = vmul.f32 0.5, %v605_v25  ;;  %v746_v33 = vadd.f32 1.0, %v1324_v27  ;;  %v718_v0 = vmul.f32 0.044715, %v710_v48  ;;  %v583_v34 = vadd.f32 %v575_v40, %v1677_v9 }
 0x230   :  { %v1328_v35 = vpop.eup %1327  ;;  %v593_v36 = vmul.f32 0.7978846, %v585_v28  ;;  %v716_v37 = vmul.f32 0.044715, %v708_v60  ;;  %v586_v38 = vadd.f32 %v578_v29, %v1682_v43  ;;  %v711_v41 = vmul.f32 %v703_v26, %v1702_v54 }
 0x231   :  { %v1330_v42 = vpop.eup %1329  ;;  %v621_v46 = vmul.f32 %v613_v32, %v1618_v1  ;;  %v754_v51 = vmul.f32 0.5, %v746_v33  ;;  %v606_v39 = vadd.f32 1.0, %v1328_v35  ;;  %v726_v56 = vadd.f32 %v718_v0, %v1685_v3 }
 0x232   :  { %v1332_v52 = vpop.eup %1331  ;;  %v747_v57 = vadd.f32 1.0, %v1330_v42  ;;  %1337 = vtanh.f32 %v593_v36  ;;  %v591_v45 = vmul.f32 0.7978846, %v583_v34  ;;  %v724_v55 = vadd.f32 %v716_v37, %v1694_v11 }
 0x233   :  { %v1334_v58 = vpop.eup %1333  ;;  %v762_v61 = vmul.f32 %v754_v51, %v1626_v6  ;;  %v614_v50 = vmul.f32 0.5, %v606_v39  ;;  %v734_v13 = vmul.f32 0.7978846, %v726_v56  ;;  %v594_v62 = vmul.f32 0.7978846, %v586_v38 }
 0x234   :  { %v1336_v63 = vpop.eup %1335  ;;  %v755_v2 = vmul.f32 0.5, %v747_v57  ;;  %1339 = vtanh.f32 %v591_v45  ;;  %v732_v1 = vmul.f32 0.7978846, %v724_v55  ;;  %v719_v44 = vmul.f32 0.044715, %v711_v41 }
 0x235   :  { %v622_v5 = vmul.f32 %v614_v50, %v1629_v8  ;;  %1341 = vtanh.f32 %v734_v13  ;;  %v576_v10 = vmul.f32 0.044715, %v568_v30  ;;  %v701_v14 = vmul.f32 %v1710_v24, %v1710_v24 }
 0x236   :  { %v763_v53 = vmul.f32 %v755_v2, %v1645_v18  ;;  %1343 = vtanh.f32 %v732_v1  ;;  %v727_v6 = vadd.f32 %v719_v44, %v1702_v54  ;;  %v603_v16 = vadd.f32 1.0, %v1326_v31 }
 0x237   :  { %v788_v17 = vpack.c.bf16 %v622_v5, %v621_v46  ;;  %1345 = vtanh.f32 %v594_v62  ;;  %v584_v19 = vadd.f32 %v576_v10, %v1690_v7  ;;  %v709_v20 = vmul.f32 %v701_v14, %v1710_v24 }
 0x238   :  { %v911_v47 = vpack.c.bf16 %v763_v53, %v762_v61  ;;  %v735_v22 = vmul.f32 0.7978846, %v727_v6  ;;  %v604_v8 = vadd.f32 1.0, %v1334_v58  ;;  %v611_v23 = vmul.f32 0.5, %v603_v16 }
 0x239   :  { %v592_v59 = vmul.f32 0.7978846, %v584_v19  ;;  %v717_v25 = vmul.f32 0.044715, %v709_v20  ;;  %v744_v48 = vadd.f32 1.0, %v1332_v52  ;;  %v745_v40 = vadd.f32 1.0, %v1336_v63 }
 0x23a   :  { %1347 = vtanh.f32 %v735_v22  ;;  %v612_v18 = vmul.f32 0.5, %v604_v8  ;;  %v619_v29 = vmul.f32 %v611_v23, %v1621_v4 }
 0x23b   :  { %1349 = vtanh.f32 %v592_v59  ;;  %v725_v26 = vadd.f32 %v717_v25, %v1710_v24  ;;  %v752_v27 = vmul.f32 0.5, %v744_v48  ;;  %v753_v28 = vmul.f32 0.5, %v745_v40 }
 0x23c   :  { %v1338_v60 = vpop.eup %1337  ;;  %v620_v30 = vmul.f32 %v612_v18, %v1637_v15 }
 0x23d   :  { %v733_v31 = vmul.f32 0.7978846, %v725_v26  ;;  %v760_v32 = vmul.f32 %v752_v27, %v1634_v12  ;;  %v761_v33 = vmul.f32 %v753_v28, %v1653_v21  ;;  %v609_v35 = vadd.f32 1.0, %v1338_v60 }
 0x23e   :  { %v1340_v0 = vpop.eup %1339  ;;  %v787_v34 = vpack.c.bf16 %v620_v30, %v619_v29 }
 0x23f   :  { %v1342_v36 = vpop.eup %1341  ;;  %1351 = vtanh.f32 %v733_v31  ;;  %v910_v37 = vpack.c.bf16 %v761_v33, %v760_v32  ;;  %v607_v42 = vadd.f32 1.0, %v1340_v0  ;;  %v617_v46 = vmul.f32 0.5, %v609_v35 }
 0x240   :  { %v1344_v38 = vpop.eup %1343  ;;  %1226 = vmatprep.mubr.bf16.mxu0 %v787_v34  ;;  %v750_v4 = vadd.f32 1.0, %v1342_v36 }
 0x241   :  { %v1346_v41 = vpop.eup %1345  ;;  %1250 = vmatprep.mubr.bf16.mxu1 %v910_v37  ;;  %1227 = vmatmul.mubr.bf16.vlgmr.msra.gmra.mrb[16].mxu0 %v788_v17  ;;  %v615_v21 = vmul.f32 0.5, %v607_v42  ;;  %v748_v45 = vadd.f32 1.0, %v1344_v38  ;;  %v625_v55 = vmul.f32 %v617_v46, %v1674_v49 }
 0x242   :  { %1251 = vmatmul.mubr.bf16.vlgmr.msra.gmra.mrb[16].mxu1 %v911_v47  ;;  %v610_v15 = vadd.f32 1.0, %v1346_v41  ;;  %v758_v52 = vmul.f32 0.5, %v750_v4 }
 0x243   :  { %v623_v1 = vmul.f32 %v615_v21, %v1677_v9  ;;  %v756_v10 = vmul.f32 0.5, %v748_v45  ;;  %v1033_v9 = vld [vmem:[%s1765_s2 + $0x2] ss:$0 sm:$0xff]  ;;  %s1431_s2 = smov [#allocation7]  }
 0x244   :  { %v1348_v51 = vpop.eup %1347  ;;  %v618_v12 = vmul.f32 0.5, %v610_v15  ;;  %v766_v63 = vmul.f32 %v758_v52, %v1685_v3  ;;  %s1000_s17 = sshll.u32 %s1431_s2, 4  ;;  %s1001_s17 = int_to_ptr.vmem [resolvable:$true] %s1000_s17 }
 0x245   :  { %v1350_v39 = vpop.eup %1349  ;;  %v751_v56 = vadd.f32 1.0, %v1348_v51  ;;  %v764_v49 = vmul.f32 %v756_v10, %v1694_v11  ;;  %s1397_s18 = scalar_lea.vmem %s1001_s17, 2048  ;;  %p1402_p3 = scmp.lt.s32.totalorder %s1001_s17, %s1001_s17 }
 0x246   :  { %v608_v57 = vadd.f32 1.0, %v1350_v39  ;;  %v626_v58 = vmul.f32 %v618_v12, %v1682_v43  ;;  %p1398_p2 = scmp.ne.s32.totalorder %s1001_s17, %s1397_s18  ;;  %p1403_p4 = scmp.lt.s32.totalorder %s1397_s18, %s1397_s18 }
 0x247   :  { %v759_v61 = vmul.f32 0.5, %v751_v56 }
 0x248   :  { %v616_v50 = vmul.f32 0.5, %v608_v57  ;;  %v790_v13 = vpack.c.bf16 %v626_v58, %v625_v55  ;;  %p1404_p5 = por %p1403_p4, %p1402_p3 }
 0x249   :  { %v1352_v62 = vpop.eup %1351  ;;  %v767_v2 = vmul.f32 %v759_v61, %v1702_v54 }
 0x24a   :  { %v624_v44 = vmul.f32 %v616_v50, %v1690_v7  ;;  %v749_v5 = vadd.f32 1.0, %v1352_v62  ;;  %p1405_p6 = pnand %p1404_p5, %p1398_p2 }
 0x24b   :  { %v913_v14 = vpack.c.bf16 %v767_v2, %v766_v63 }
 0x24c   :  { %v789_v53 = vpack.c.bf16 %v624_v44, %v623_v1  ;;  %v757_v6 = vmul.f32 0.5, %v749_v5 }
 0x24e   :  { %1230 = vmatprep.mubr.bf16.mxu0 %v789_v53  ;;  %v765_v43 = vmul.f32 %v757_v6, %v1710_v24 }
 0x24f   :  { %1231 = vmatmul.mubr.bf16.gmra.mrb[20].mxu0 %v790_v13 }
 0x250   :  { %v912_v16 = vpack.c.bf16 %v765_v43, %v764_v49 }
 0x252   :  { %1254 = vmatprep.mubr.bf16.mxu1 %v912_v16 }
 0x253   :  { %1255 = vmatmul.mubr.bf16.gmra.mrb[20].mxu1 %v913_v14 }
 0x314   :  { %v1228_v3 = vpop.f32.mrb[16].mxu0 }
 0x315   :  { %v888_v7 = vadd.f32 %v1228_v3, %v1033_v9  ;;  %v1252_v54 = vpop.f32.mrb[16].mxu1  ;;  %v879_v17 = vpop.f32.mrb[17].mxu0 }
 0x316   :  { %v957_v19 = vadd.f32 %v1252_v54, %v1033_v9  ;;  %v880_v20 = vadd.f32 %v1033_v9, %v879_v17  ;;  %v948_v47 = vpop.f32.mrb[17].mxu1  ;;  %v1229_v22 = vpop.f32.mrb[18].mxu0 }
 0x317   :  { %981 = vst [vmem:[#allocation7 + $0x10] sm:$0xff] %v888_v7  ;;  %v949_v11 = vadd.f32 %v1033_v9, %v948_v47  ;;  %v891_v8 = vadd.f32 %v1229_v22, %v1033_v9  ;;  %v1253_v24 = vpop.f32.mrb[18].mxu1  ;;  %v882_v23 = vpop.f32.mrb[19].mxu0 }
 0x318   :  { %989 = vst [vmem:[#allocation7 + $0x50] sm:$0xff] %v957_v19  ;;  %979 = vst [vmem:[#allocation7] sm:$0xff] %v880_v20  ;;  %v960_v59 = vadd.f32 %v1253_v24, %v1033_v9  ;;  %v883_v25 = vadd.f32 %v1033_v9, %v882_v23  ;;  %v951_v48 = vpop.f32.mrb[19].mxu1 }
 0x319   :  { %987 = vst [vmem:[#allocation7 + $0x40] sm:$0xff] %v949_v11  ;;  %982 = vst [vmem:[#allocation7 + $0x18] sm:$0xff] %v891_v8  ;;  %v952_v40 = vadd.f32 %v1033_v9, %v951_v48 }
 0x31a   :  { %990 = vst [vmem:[#allocation7 + $0x58] sm:$0xff] %v960_v59  ;;  %980 = vst [vmem:[#allocation7 + $0x8] sm:$0xff] %v883_v25 }
 0x31b   :  { %988 = vst [vmem:[#allocation7 + $0x48] sm:$0xff] %v952_v40 }
 0x322   :  { %v1232_v18 = vpop.f32.mrb[20].mxu0 }
 0x323   :  { %v904_v26 = vadd.f32 %v1232_v18, %v1033_v9  ;;  %v895_v27 = vpop.f32.mrb[21].mxu0 }
 0x324   :  { %v896_v28 = vadd.f32 %v1033_v9, %v895_v27  ;;  %v1233_v60 = vpop.f32.mrb[22].mxu0 }
 0x325   :  { %985 = vst [vmem:[#allocation7 + $0x30] sm:$0xff] %v904_v26  ;;  %v907_v29 = vadd.f32 %v1233_v60, %v1033_v9  ;;  %v898_v30 = vpop.f32.mrb[23].mxu0 }
 0x326   :  { %v1256_v31 = vpop.f32.mrb[20].mxu1  ;;  %983 = vst [vmem:[#allocation7 + $0x20] sm:$0xff] %v896_v28  ;;  %v899_v32 = vadd.f32 %v1033_v9, %v898_v30 }
 0x327   :  { %v973_v33 = vadd.f32 %v1256_v31, %v1033_v9  ;;  %v964_v0 = vpop.f32.mrb[21].mxu1  ;;  %986 = vst [vmem:[#allocation7 + $0x38] sm:$0xff] %v907_v29 }
 0x328   :  { %v965_v34 = vadd.f32 %v1033_v9, %v964_v0  ;;  %v1257_v35 = vpop.f32.mrb[22].mxu1  ;;  %984 = vst [vmem:[#allocation7 + $0x28] sm:$0xff] %v899_v32 }
 0x329   :  { %993 = vst [vmem:[#allocation7 + $0x70] sm:$0xff] %v973_v33  ;;  %v976_v36 = vadd.f32 %v1257_v35, %v1033_v9  ;;  %v967_v37 = vpop.f32.mrb[23].mxu1 }
 0x32a   :  { %991 = vst [vmem:[#allocation7 + $0x60] sm:$0xff] %v965_v34  ;;  %v968_v38 = vadd.f32 %v1033_v9, %v967_v37 }
 0x32b   :  { %994 = vst [vmem:[#allocation7 + $0x78] sm:$0xff] %v976_v36 }
 0x32c   :  { %992 = vst [vmem:[#allocation7 + $0x68] sm:$0xff] %v968_v38 }
 0x32d   :  { %1408 = shalt.err (!%p1405_p6)
}
 0x32e   :  { %s1409_s21 = scalar_lea.hbm %s1766_s3, 2048 }
 0x32f   :  { %p1410_p7 = scmp.ne.s32.totalorder %s1766_s3, %s1409_s21  ;;  %p1413_p8 = scmp.lt.u32.totalorder %s1409_s21, %s1766_s3 }
 0x331   :  { %p1415_p9 = pnand %p1413_p8, %p1410_p7 }
 0x333   :  { %1418 = shalt.err (!%p1415_p9)
}
 0x334   :  { %1006 = dma.vmem_to_hbm [thread:$0]  %s1001_s17, 2048, %s1766_s3, [#allocation4], %s1426_s22, %s1426_s22, %s1427_s23  }
 0x335   :  { %1423 = dma.done.wait [#allocation4], 2048  }
 0x336   :  { %1424 = vsyncadd [#allocation4], 4294965248 }
 0x337   :  { %1010 = vsyncpa [#allocation3], 1 }
 0x338   :  { %1011 = vsyncpa [#allocation6], 1 }
 0x339   :  { %1012 = vsyncpa [#allocation4], 1 }

</bundles_post_ra>
